<compile_context>
chip_gen: v7x
topology: tpu7x:2x2x1
jax: 0.10.0
libtpu: 0.0.40
codegen_flags: <defaults>
</compile_context>

<pallas_src>
import functools
import math

import jax
import jax.numpy as jnp
from jax.experimental import pallas as pl
from jax.experimental.pallas import tpu as pltpu


def _cross_conv_kernel(w2_ref, b_ref, xf_ref, xe_ref, o_ref, *, cf, cout, s,
                       tile_h):
    """One (batch, coarse-row-tile) grid step; writes a final NCHW output tile.

    w2_ref: (s*Cout, Cc*s)           rows (i,o), cols (c,j); grid-invariant.
    b_ref : (Cout, 1)                bias column (f32); grid-invariant.
    xf_ref: (1, Cf, tile_h*s, Ws)    fine-input tile (passthrough channels).
    xe_ref: (1, tile_h, Cc*s, Ws)    zero-expanded coarse tile (columns already
                                     interleaved to fine columns q = w*s+j).
    o_ref : (1, Cf+Cout, tile_h*s, Ws)  final output tile (NCHW layout).
    """
    # Passthrough copy of the fine-resolution input channels (fused concat).
    if cf > 0:
        o_ref[0, :cf] = xf_ref[0]

    w2 = w2_ref[...]
    b = b_ref[...]
    for h in range(tile_h):                       # static unroll
        # (s*Cout, Cc*s) @ (Cc*s, Ws) -> (s*Cout, Ws).  Lane dim is already the
        # final fine column index, so no in-kernel relayout is needed.
        res = jnp.dot(w2, xe_ref[0, h], preferred_element_type=jnp.float32)
        for i in range(s):                        # static unroll
            slab = res[i * cout:(i + 1) * cout, :] + b
            o_ref[0, cf:cf + cout, h * s + i, :] = slab.astype(o_ref.dtype)


def _pick_row_tile(H, s, per_row_bytes, budget=4 * 1024 * 1024):
    """Largest coarse-row tile that divides H, keeps the fine-row block a
    sublane multiple (or full extent), and fits the VMEM budget when
    double-buffered."""
    cands = [t for t in range(1, H + 1)
             if H % t == 0 and ((t * s) % 8 == 0 or t == H)]
    fitting = [t for t in cands if 2 * t * per_row_bytes <= budget]
    return max(fitting) if fitting else min(cands)


def cross_conv(xf, xc, weight, bias, scale_factor=2):
    """Pallas implementation of CrossConv.forward.

    xf:     (N, C_f, H*s, W*s)   NCHW fine input (passthrough channels)
    xc:     (N, C_c, H, W)       NCHW coarse input
    weight: (C_c, C_out, s, s)   PyTorch ConvTranspose2d weight layout
    bias:   (C_out,)
    returns (N, C_f + C_out, H*s, W*s) NCHW
    """
    s = scale_factor
    N, Cc, H, W = xc.shape
    Cout = weight.shape[1]
    Cf = xf.shape[1]
    Ctot = Cf + Cout
    Hs, Ws = H * s, W * s
    assert xf.shape == (N, Cf, Hs, Ws), xf.shape
    out_dtype = xf.dtype
    itemsize = jnp.dtype(out_dtype).itemsize

    # --- cheap operand prep (one pass over the small xc / weight) -----------
    # W2[(i,o), (c,j)] = weight[c, o, i, j]
    w2 = jnp.transpose(weight, (2, 1, 0, 3)).reshape(s * Cout, Cc * s)
    b_col = bias.reshape(Cout, 1).astype(jnp.float32)
    # Zero-expanded coarse input: XE[n, h, c*s+j, w*s+j'] = xc[n,c,h,w]*(j==j').
    eye = jnp.eye(s, dtype=xc.dtype)
    xc_t = jnp.transpose(xc, (0, 2, 1, 3))                        # (N, H, Cc, W)
    xe = xc_t[:, :, :, None, :, None] * eye[None, None, None, :, None, :]
    xe = xe.reshape(N, H, Cc * s, Ws)

    # --- tiling --------------------------------------------------------------
    lanes_p = pl.cdiv(Ws, 128) * 128
    per_row_bytes = itemsize * lanes_p * (
        s * Ctot + s * Cf + pl.cdiv(Cc * s, 8) * 8)
    tile_h = _pick_row_tile(H, s, per_row_bytes)
    grid = (N, H // tile_h)

    cost = pl.CostEstimate(
        flops=2 * N * H * (s * Cout) * (Cc * s) * Ws,
        transcendentals=0,
        bytes_accessed=(w2.size + b_col.size + xf.size + xe.size
                        + N * Ctot * Hs * Ws) * itemsize,
    )

    kernel = functools.partial(_cross_conv_kernel, cf=Cf, cout=Cout, s=s,
                               tile_h=tile_h)
    return pl.pallas_call(
        kernel,
        out_shape=jax.ShapeDtypeStruct((N, Ctot, Hs, Ws), out_dtype),
        grid=grid,
        in_specs=[
            pl.BlockSpec((s * Cout, Cc * s), lambda n, t: (0, 0)),
            pl.BlockSpec((Cout, 1), lambda n, t: (0, 0)),
            pl.BlockSpec((1, Cf, tile_h * s, Ws), lambda n, t: (n, 0, t, 0)),
            pl.BlockSpec((1, tile_h, Cc * s, Ws), lambda n, t: (n, t, 0, 0)),
        ],
        out_specs=pl.BlockSpec((1, Ctot, tile_h * s, Ws),
                               lambda n, t: (n, 0, t, 0)),
        compiler_params=pltpu.CompilerParams(
            dimension_semantics=("parallel", "parallel")),
        cost_estimate=cost,
    )(w2, b_col, xf, xe)


def _reference(xf, xc, weight, bias, scale_factor=2):
    # Pure-JAX reference matching PyTorch ConvTranspose2d(kernel=stride=s).
    s = scale_factor
    N, Cc, H, W = xc.shape
    Cout = weight.shape[1]
    x = jnp.einsum("nihw,iokl->nohkwl", xc, weight)
    x = x.reshape(N, Cout, H * s, W * s) + bias[None, :, None, None]
    return jnp.concatenate([xf, x], axis=1)


if __name__ == "__main__":
    # dim=8 (convt out channels), dim_c=4 (coarse channels), scale_factor=2,
    # coarse spatial 16x16 -> fine 32x32.
    dim, dim_c, s = 8, 4, 2
    N, H, W = 2, 16, 16
    Cf = dim  # xf channel count

    key = jax.random.PRNGKey(0)
    k_xf, k_xc, k_w, k_b = jax.random.split(key, 4)
    xf = jax.random.normal(k_xf, (N, Cf, H * s, W * s), dtype=jnp.float32)
    xc = jax.random.normal(k_xc, (N, dim_c, H, W), dtype=jnp.float32)
    # ConvTranspose2d weight shape: (in_channels, out_channels, kH, kW)
    weight = jax.random.normal(k_w, (dim_c, dim, s, s), dtype=jnp.float32) * 0.1
    bias = jax.random.normal(k_b, (dim,), dtype=jnp.float32) * 0.1

    fn = jax.jit(functools.partial(cross_conv, scale_factor=s))
    out = jax.block_until_ready(fn(xf, xc, weight, bias))

    ref = _reference(xf, xc, weight, bias, scale_factor=s)
    assert out.shape == (N, Cf + dim, H * s, W * s), out.shape
    assert jnp.allclose(out, ref, atol=1e-5, rtol=1e-5), "mismatch vs reference"

    print("KERNEL_OK")
</pallas_src>

<mosaic_0001>
module attributes {stable_mosaic.version = 11 : i64} {
  func.func @_cross_conv_kernel(%arg0: i32, %arg1: i32, %arg2: memref<16x8xf32, #tpu.memory_space<vmem>>, %arg3: memref<8x1xf32, #tpu.memory_space<vmem>>, %arg4: memref<1x8x32x32xf32, #tpu.memory_space<vmem>>, %arg5: memref<1x16x8x32xf32, #tpu.memory_space<vmem>>, %arg6: memref<1x16x32x32xf32, #tpu.memory_space<vmem>>) attributes {dimension_semantics = [#tpu.dimension_semantics<parallel>, #tpu.dimension_semantics<parallel>], iteration_bounds = array<i64: 2, 1>, scalar_prefetch = 0 : i64, scratch_operands = 0 : i64, tpu.core_type = #tpu.core_type<tc>, window_params = [{pipeline_mode = #tpu.pipeline_mode<synchronous>, transform_indices = @transform_0, window_bounds = array<i64: 16, 8>}, {pipeline_mode = #tpu.pipeline_mode<synchronous>, transform_indices = @transform_1, window_bounds = array<i64: 8, 1>}, {transform_indices = @transform_2, window_bounds = array<i64: 1, 8, 32, 32>}, {transform_indices = @transform_3, window_bounds = array<i64: 1, 16, 8, 32>}, {transform_indices = @transform_4, window_bounds = array<i64: 1, 16, 32, 32>}]} {
    %c0 = arith.constant 0 : index
    %c0_0 = arith.constant 0 : index
    %c0_1 = arith.constant 0 : index
    %c0_2 = arith.constant 0 : index
    %0 = vector.load %arg4[%c0, %c0_0, %c0_1, %c0_2] : memref<1x8x32x32xf32, #tpu.memory_space<vmem>>, vector<1x8x32x32xf32>
    %1 = vector.shape_cast %0 : vector<1x8x32x32xf32> to vector<8x32x32xf32>
    %c0_3 = arith.constant 0 : index
    %c0_4 = arith.constant 0 : index
    %c0_5 = arith.constant 0 : index
    %c0_6 = arith.constant 0 : index
    %2 = vector.load %arg6[%c0_3, %c0_4, %c0_5, %c0_6] : memref<1x16x32x32xf32, #tpu.memory_space<vmem>>, vector<1x8x32x32xf32>
    %3 = vector.shape_cast %2 : vector<1x8x32x32xf32> to vector<8x32x32xf32>
    %4 = vector.shape_cast %1 : vector<8x32x32xf32> to vector<1x8x32x32xf32>
    tpu.vector_store %arg6[%c0_3, %c0_4, %c0_5, %c0_6], %4 {strides = array<i32>} : memref<1x16x32x32xf32, #tpu.memory_space<vmem>>, vector<1x8x32x32xf32>,
    %c0_7 = arith.constant 0 : index
    %c0_8 = arith.constant 0 : index
    %5 = vector.load %arg2[%c0_7, %c0_8] : memref<16x8xf32, #tpu.memory_space<vmem>>, vector<16x8xf32>
    %c0_9 = arith.constant 0 : index
    %c0_10 = arith.constant 0 : index
    %6 = vector.load %arg3[%c0_9, %c0_10] : memref<8x1xf32, #tpu.memory_space<vmem>>, vector<8x1xf32>
    %c0_11 = arith.constant 0 : index
    %c0_12 = arith.constant 0 : index
    %c0_13 = arith.constant 0 : index
    %c0_14 = arith.constant 0 : index
    %7 = vector.load %arg5[%c0_11, %c0_12, %c0_13, %c0_14] : memref<1x16x8x32xf32, #tpu.memory_space<vmem>>, vector<1x1x8x32xf32>
    %8 = vector.shape_cast %7 : vector<1x1x8x32xf32> to vector<8x32xf32>
    %cst = arith.constant dense<0.000000e+00> : vector<16x32xf32>
    %9 = tpu.matmul %5, %8, %cst {dimension_numbers = #tpu.dot_dimension_numbers<[1], [0], [0], [1], [0, 0, 1, 1], [], []>} : vector<16x8xf32>, vector<8x32xf32>, vector<16x32xf32> -> vector<16x32xf32>
    %10 = vector.extract_strided_slice %9 {offsets = [0, 0], sizes = [8, 32], strides = [1, 1]} : vector<16x32xf32> to vector<8x32xf32>
    %11 = vector.broadcast %6 : vector<8x1xf32> to vector<8x32xf32>
    %12 = arith.addf %10, %11 : vector<8x32xf32>
    %c0_15 = arith.constant 0 : index
    %c8 = arith.constant 8 : index
    %c0_16 = arith.constant 0 : index
    %c0_17 = arith.constant 0 : index
    %13 = vector.load %arg6[%c0_15, %c8, %c0_16, %c0_17] : memref<1x16x32x32xf32, #tpu.memory_space<vmem>>, vector<1x8x1x32xf32>
    %14 = vector.shape_cast %13 : vector<1x8x1x32xf32> to vector<8x32xf32>
    %15 = vector.shape_cast %12 : vector<8x32xf32> to vector<1x8x1x32xf32>
    tpu.vector_store %arg6[%c0_15, %c8, %c0_16, %c0_17], %15 {strides = array<i32>} : memref<1x16x32x32xf32, #tpu.memory_space<vmem>>, vector<1x8x1x32xf32>,
    %16 = vector.extract_strided_slice %9 {offsets = [8, 0], sizes = [8, 32], strides = [1, 1]} : vector<16x32xf32> to vector<8x32xf32>
    %17 = vector.broadcast %6 : vector<8x1xf32> to vector<8x32xf32>
    %18 = arith.addf %16, %17 : vector<8x32xf32>
    %c0_18 = arith.constant 0 : index
    %c8_19 = arith.constant 8 : index
    %c1 = arith.constant 1 : index
    %c0_20 = arith.constant 0 : index
    %19 = vector.load %arg6[%c0_18, %c8_19, %c1, %c0_20] : memref<1x16x32x32xf32, #tpu.memory_space<vmem>>, vector<1x8x1x32xf32>
    %20 = vector.shape_cast %19 : vector<1x8x1x32xf32> to vector<8x32xf32>
    %21 = vector.shape_cast %18 : vector<8x32xf32> to vector<1x8x1x32xf32>
    tpu.vector_store %arg6[%c0_18, %c8_19, %c1, %c0_20], %21 {strides = array<i32>} : memref<1x16x32x32xf32, #tpu.memory_space<vmem>>, vector<1x8x1x32xf32>,
    %c0_21 = arith.constant 0 : index
    %c1_22 = arith.constant 1 : index
    %c0_23 = arith.constant 0 : index
    %c0_24 = arith.constant 0 : index
    %22 = vector.load %arg5[%c0_21, %c1_22, %c0_23, %c0_24] : memref<1x16x8x32xf32, #tpu.memory_space<vmem>>, vector<1x1x8x32xf32>
    %23 = vector.shape_cast %22 : vector<1x1x8x32xf32> to vector<8x32xf32>
    %cst_25 = arith.constant dense<0.000000e+00> : vector<16x32xf32>
    %24 = tpu.matmul %5, %23, %cst_25 {dimension_numbers = #tpu.dot_dimension_numbers<[1], [0], [0], [1], [0, 0, 1, 1], [], []>} : vector<16x8xf32>, vector<8x32xf32>, vector<16x32xf32> -> vector<16x32xf32>
    %25 = vector.extract_strided_slice %24 {offsets = [0, 0], sizes = [8, 32], strides = [1, 1]} : vector<16x32xf32> to vector<8x32xf32>
    %26 = vector.broadcast %6 : vector<8x1xf32> to vector<8x32xf32>
    %27 = arith.addf %25, %26 : vector<8x32xf32>
    %c0_26 = arith.constant 0 : index
    %c8_27 = arith.constant 8 : index
    %c2 = arith.constant 2 : index
    %c0_28 = arith.constant 0 : index
    %28 = vector.load %arg6[%c0_26, %c8_27, %c2, %c0_28] : memref<1x16x32x32xf32, #tpu.memory_space<vmem>>, vector<1x8x1x32xf32>
    %29 = vector.shape_cast %28 : vector<1x8x1x32xf32> to vector<8x32xf32>
    %30 = vector.shape_cast %27 : vector<8x32xf32> to vector<1x8x1x32xf32>
    tpu.vector_store %arg6[%c0_26, %c8_27, %c2, %c0_28], %30 {strides = array<i32>} : memref<1x16x32x32xf32, #tpu.memory_space<vmem>>, vector<1x8x1x32xf32>,
    %31 = vector.extract_strided_slice %24 {offsets = [8, 0], sizes = [8, 32], strides = [1, 1]} : vector<16x32xf32> to vector<8x32xf32>
    %32 = vector.broadcast %6 : vector<8x1xf32> to vector<8x32xf32>
    %33 = arith.addf %31, %32 : vector<8x32xf32>
    %c0_29 = arith.constant 0 : index
    %c8_30 = arith.constant 8 : index
    %c3 = arith.constant 3 : index
    %c0_31 = arith.constant 0 : index
    %34 = vector.load %arg6[%c0_29, %c8_30, %c3, %c0_31] : memref<1x16x32x32xf32, #tpu.memory_space<vmem>>, vector<1x8x1x32xf32>
    %35 = vector.shape_cast %34 : vector<1x8x1x32xf32> to vector<8x32xf32>
    %36 = vector.shape_cast %33 : vector<8x32xf32> to vector<1x8x1x32xf32>
    tpu.vector_store %arg6[%c0_29, %c8_30, %c3, %c0_31], %36 {strides = array<i32>} : memref<1x16x32x32xf32, #tpu.memory_space<vmem>>, vector<1x8x1x32xf32>,
    %c0_32 = arith.constant 0 : index
    %c2_33 = arith.constant 2 : index
    %c0_34 = arith.constant 0 : index
    %c0_35 = arith.constant 0 : index
    %37 = vector.load %arg5[%c0_32, %c2_33, %c0_34, %c0_35] : memref<1x16x8x32xf32, #tpu.memory_space<vmem>>, vector<1x1x8x32xf32>
    %38 = vector.shape_cast %37 : vector<1x1x8x32xf32> to vector<8x32xf32>
    %cst_36 = arith.constant dense<0.000000e+00> : vector<16x32xf32>
    %39 = tpu.matmul %5, %38, %cst_36 {dimension_numbers = #tpu.dot_dimension_numbers<[1], [0], [0], [1], [0, 0, 1, 1], [], []>} : vector<16x8xf32>, vector<8x32xf32>, vector<16x32xf32> -> vector<16x32xf32>
    %40 = vector.extract_strided_slice %39 {offsets = [0, 0], sizes = [8, 32], strides = [1, 1]} : vector<16x32xf32> to vector<8x32xf32>
    %41 = vector.broadcast %6 : vector<8x1xf32> to vector<8x32xf32>
    %42 = arith.addf %40, %41 : vector<8x32xf32>
    %c0_37 = arith.constant 0 : index
    %c8_38 = arith.constant 8 : index
    %c4 = arith.constant 4 : index
    %c0_39 = arith.constant 0 : index
    %43 = vector.load %arg6[%c0_37, %c8_38, %c4, %c0_39] : memref<1x16x32x32xf32, #tpu.memory_space<vmem>>, vector<1x8x1x32xf32>
    %44 = vector.shape_cast %43 : vector<1x8x1x32xf32> to vector<8x32xf32>
    %45 = vector.shape_cast %42 : vector<8x32xf32> to vector<1x8x1x32xf32>
    tpu.vector_store %arg6[%c0_37, %c8_38, %c4, %c0_39], %45 {strides = array<i32>} : memref<1x16x32x32xf32, #tpu.memory_space<vmem>>, vector<1x8x1x32xf32>,
    %46 = vector.extract_strided_slice %39 {offsets = [8, 0], sizes = [8, 32], strides = [1, 1]} : vector<16x32xf32> to vector<8x32xf32>
    %47 = vector.broadcast %6 : vector<8x1xf32> to vector<8x32xf32>
    %48 = arith.addf %46, %47 : vector<8x32xf32>
    %c0_40 = arith.constant 0 : index
    %c8_41 = arith.constant 8 : index
    %c5 = arith.constant 5 : index
    %c0_42 = arith.constant 0 : index
    %49 = vector.load %arg6[%c0_40, %c8_41, %c5, %c0_42] : memref<1x16x32x32xf32, #tpu.memory_space<vmem>>, vector<1x8x1x32xf32>
    %50 = vector.shape_cast %49 : vector<1x8x1x32xf32> to vector<8x32xf32>
    %51 = vector.shape_cast %48 : vector<8x32xf32> to vector<1x8x1x32xf32>
    tpu.vector_store %arg6[%c0_40, %c8_41, %c5, %c0_42], %51 {strides = array<i32>} : memref<1x16x32x32xf32, #tpu.memory_space<vmem>>, vector<1x8x1x32xf32>,
    %c0_43 = arith.constant 0 : index
    %c3_44 = arith.constant 3 : index
    %c0_45 = arith.constant 0 : index
    %c0_46 = arith.constant 0 : index
    %52 = vector.load %arg5[%c0_43, %c3_44, %c0_45, %c0_46] : memref<1x16x8x32xf32, #tpu.memory_space<vmem>>, vector<1x1x8x32xf32>
    %53 = vector.shape_cast %52 : vector<1x1x8x32xf32> to vector<8x32xf32>
    %cst_47 = arith.constant dense<0.000000e+00> : vector<16x32xf32>
    %54 = tpu.matmul %5, %53, %cst_47 {dimension_numbers = #tpu.dot_dimension_numbers<[1], [0], [0], [1], [0, 0, 1, 1], [], []>} : vector<16x8xf32>, vector<8x32xf32>, vector<16x32xf32> -> vector<16x32xf32>
    %55 = vector.extract_strided_slice %54 {offsets = [0, 0], sizes = [8, 32], strides = [1, 1]} : vector<16x32xf32> to vector<8x32xf32>
    %56 = vector.broadcast %6 : vector<8x1xf32> to vector<8x32xf32>
    %57 = arith.addf %55, %56 : vector<8x32xf32>
    %c0_48 = arith.constant 0 : index
    %c8_49 = arith.constant 8 : index
    %c6 = arith.constant 6 : index
    %c0_50 = arith.constant 0 : index
    %58 = vector.load %arg6[%c0_48, %c8_49, %c6, %c0_50] : memref<1x16x32x32xf32, #tpu.memory_space<vmem>>, vector<1x8x1x32xf32>
    %59 = vector.shape_cast %58 : vector<1x8x1x32xf32> to vector<8x32xf32>
    %60 = vector.shape_cast %57 : vector<8x32xf32> to vector<1x8x1x32xf32>
    tpu.vector_store %arg6[%c0_48, %c8_49, %c6, %c0_50], %60 {strides = array<i32>} : memref<1x16x32x32xf32, #tpu.memory_space<vmem>>, vector<1x8x1x32xf32>,
    %61 = vector.extract_strided_slice %54 {offsets = [8, 0], sizes = [8, 32], strides = [1, 1]} : vector<16x32xf32> to vector<8x32xf32>
    %62 = vector.broadcast %6 : vector<8x1xf32> to vector<8x32xf32>
    %63 = arith.addf %61, %62 : vector<8x32xf32>
    %c0_51 = arith.constant 0 : index
    %c8_52 = arith.constant 8 : index
    %c7 = arith.constant 7 : index
    %c0_53 = arith.constant 0 : index
    %64 = vector.load %arg6[%c0_51, %c8_52, %c7, %c0_53] : memref<1x16x32x32xf32, #tpu.memory_space<vmem>>, vector<1x8x1x32xf32>
    %65 = vector.shape_cast %64 : vector<1x8x1x32xf32> to vector<8x32xf32>
    %66 = vector.shape_cast %63 : vector<8x32xf32> to vector<1x8x1x32xf32>
    tpu.vector_store %arg6[%c0_51, %c8_52, %c7, %c0_53], %66 {strides = array<i32>} : memref<1x16x32x32xf32, #tpu.memory_space<vmem>>, vector<1x8x1x32xf32>,
    %c0_54 = arith.constant 0 : index
    %c4_55 = arith.constant 4 : index
    %c0_56 = arith.constant 0 : index
    %c0_57 = arith.constant 0 : index
    %67 = vector.load %arg5[%c0_54, %c4_55, %c0_56, %c0_57] : memref<1x16x8x32xf32, #tpu.memory_space<vmem>>, vector<1x1x8x32xf32>
    %68 = vector.shape_cast %67 : vector<1x1x8x32xf32> to vector<8x32xf32>
    %cst_58 = arith.constant dense<0.000000e+00> : vector<16x32xf32>
    %69 = tpu.matmul %5, %68, %cst_58 {dimension_numbers = #tpu.dot_dimension_numbers<[1], [0], [0], [1], [0, 0, 1, 1], [], []>} : vector<16x8xf32>, vector<8x32xf32>, vector<16x32xf32> -> vector<16x32xf32>
    %70 = vector.extract_strided_slice %69 {offsets = [0, 0], sizes = [8, 32], strides = [1, 1]} : vector<16x32xf32> to vector<8x32xf32>
    %71 = vector.broadcast %6 : vector<8x1xf32> to vector<8x32xf32>
    %72 = arith.addf %70, %71 : vector<8x32xf32>
    %c0_59 = arith.constant 0 : index
    %c8_60 = arith.constant 8 : index
    %c8_61 = arith.constant 8 : index
    %c0_62 = arith.constant 0 : index
    %73 = vector.load %arg6[%c0_59, %c8_60, %c8_61, %c0_62] : memref<1x16x32x32xf32, #tpu.memory_space<vmem>>, vector<1x8x1x32xf32>
    %74 = vector.shape_cast %73 : vector<1x8x1x32xf32> to vector<8x32xf32>
    %75 = vector.shape_cast %72 : vector<8x32xf32> to vector<1x8x1x32xf32>
    tpu.vector_store %arg6[%c0_59, %c8_60, %c8_61, %c0_62], %75 {strides = array<i32>} : memref<1x16x32x32xf32, #tpu.memory_space<vmem>>, vector<1x8x1x32xf32>,
    %76 = vector.extract_strided_slice %69 {offsets = [8, 0], sizes = [8, 32], strides = [1, 1]} : vector<16x32xf32> to vector<8x32xf32>
    %77 = vector.broadcast %6 : vector<8x1xf32> to vector<8x32xf32>
    %78 = arith.addf %76, %77 : vector<8x32xf32>
    %c0_63 = arith.constant 0 : index
    %c8_64 = arith.constant 8 : index
    %c9 = arith.constant 9 : index
    %c0_65 = arith.constant 0 : index
    %79 = vector.load %arg6[%c0_63, %c8_64, %c9, %c0_65] : memref<1x16x32x32xf32, #tpu.memory_space<vmem>>, vector<1x8x1x32xf32>
    %80 = vector.shape_cast %79 : vector<1x8x1x32xf32> to vector<8x32xf32>
    %81 = vector.shape_cast %78 : vector<8x32xf32> to vector<1x8x1x32xf32>
    tpu.vector_store %arg6[%c0_63, %c8_64, %c9, %c0_65], %81 {strides = array<i32>} : memref<1x16x32x32xf32, #tpu.memory_space<vmem>>, vector<1x8x1x32xf32>,
    %c0_66 = arith.constant 0 : index
    %c5_67 = arith.constant 5 : index
    %c0_68 = arith.constant 0 : index
    %c0_69 = arith.constant 0 : index
    %82 = vector.load %arg5[%c0_66, %c5_67, %c0_68, %c0_69] : memref<1x16x8x32xf32, #tpu.memory_space<vmem>>, vector<1x1x8x32xf32>
    %83 = vector.shape_cast %82 : vector<1x1x8x32xf32> to vector<8x32xf32>
    %cst_70 = arith.constant dense<0.000000e+00> : vector<16x32xf32>
    %84 = tpu.matmul %5, %83, %cst_70 {dimension_numbers = #tpu.dot_dimension_numbers<[1], [0], [0], [1], [0, 0, 1, 1], [], []>} : vector<16x8xf32>, vector<8x32xf32>, vector<16x32xf32> -> vector<16x32xf32>
    %85 = vector.extract_strided_slice %84 {offsets = [0, 0], sizes = [8, 32], strides = [1, 1]} : vector<16x32xf32> to vector<8x32xf32>
    %86 = vector.broadcast %6 : vector<8x1xf32> to vector<8x32xf32>
    %87 = arith.addf %85, %86 : vector<8x32xf32>
    %c0_71 = arith.constant 0 : index
    %c8_72 = arith.constant 8 : index
    %c10 = arith.constant 10 : index
    %c0_73 = arith.constant 0 : index
    %88 = vector.load %arg6[%c0_71, %c8_72, %c10, %c0_73] : memref<1x16x32x32xf32, #tpu.memory_space<vmem>>, vector<1x8x1x32xf32>
    %89 = vector.shape_cast %88 : vector<1x8x1x32xf32> to vector<8x32xf32>
    %90 = vector.shape_cast %87 : vector<8x32xf32> to vector<1x8x1x32xf32>
    tpu.vector_store %arg6[%c0_71, %c8_72, %c10, %c0_73], %90 {strides = array<i32>} : memref<1x16x32x32xf32, #tpu.memory_space<vmem>>, vector<1x8x1x32xf32>,
    %91 = vector.extract_strided_slice %84 {offsets = [8, 0], sizes = [8, 32], strides = [1, 1]} : vector<16x32xf32> to vector<8x32xf32>
    %92 = vector.broadcast %6 : vector<8x1xf32> to vector<8x32xf32>
    %93 = arith.addf %91, %92 : vector<8x32xf32>
    %c0_74 = arith.constant 0 : index
    %c8_75 = arith.constant 8 : index
    %c11 = arith.constant 11 : index
    %c0_76 = arith.constant 0 : index
    %94 = vector.load %arg6[%c0_74, %c8_75, %c11, %c0_76] : memref<1x16x32x32xf32, #tpu.memory_space<vmem>>, vector<1x8x1x32xf32>
    %95 = vector.shape_cast %94 : vector<1x8x1x32xf32> to vector<8x32xf32>
    %96 = vector.shape_cast %93 : vector<8x32xf32> to vector<1x8x1x32xf32>
    tpu.vector_store %arg6[%c0_74, %c8_75, %c11, %c0_76], %96 {strides = array<i32>} : memref<1x16x32x32xf32, #tpu.memory_space<vmem>>, vector<1x8x1x32xf32>,
    %c0_77 = arith.constant 0 : index
    %c6_78 = arith.constant 6 : index
    %c0_79 = arith.constant 0 : index
    %c0_80 = arith.constant 0 : index
    %97 = vector.load %arg5[%c0_77, %c6_78, %c0_79, %c0_80] : memref<1x16x8x32xf32, #tpu.memory_space<vmem>>, vector<1x1x8x32xf32>
    %98 = vector.shape_cast %97 : vector<1x1x8x32xf32> to vector<8x32xf32>
    %cst_81 = arith.constant dense<0.000000e+00> : vector<16x32xf32>
    %99 = tpu.matmul %5, %98, %cst_81 {dimension_numbers = #tpu.dot_dimension_numbers<[1], [0], [0], [1], [0, 0, 1, 1], [], []>} : vector<16x8xf32>, vector<8x32xf32>, vector<16x32xf32> -> vector<16x32xf32>
    %100 = vector.extract_strided_slice %99 {offsets = [0, 0], sizes = [8, 32], strides = [1, 1]} : vector<16x32xf32> to vector<8x32xf32>
    %101 = vector.broadcast %6 : vector<8x1xf32> to vector<8x32xf32>
    %102 = arith.addf %100, %101 : vector<8x32xf32>
    %c0_82 = arith.constant 0 : index
    %c8_83 = arith.constant 8 : index
    %c12 = arith.constant 12 : index
    %c0_84 = arith.constant 0 : index
    %103 = vector.load %arg6[%c0_82, %c8_83, %c12, %c0_84] : memref<1x16x32x32xf32, #tpu.memory_space<vmem>>, vector<1x8x1x32xf32>
    %104 = vector.shape_cast %103 : vector<1x8x1x32xf32> to vector<8x32xf32>
    %105 = vector.shape_cast %102 : vector<8x32xf32> to vector<1x8x1x32xf32>
    tpu.vector_store %arg6[%c0_82, %c8_83, %c12, %c0_84], %105 {strides = array<i32>} : memref<1x16x32x32xf32, #tpu.memory_space<vmem>>, vector<1x8x1x32xf32>,
    %106 = vector.extract_strided_slice %99 {offsets = [8, 0], sizes = [8, 32], strides = [1, 1]} : vector<16x32xf32> to vector<8x32xf32>
    %107 = vector.broadcast %6 : vector<8x1xf32> to vector<8x32xf32>
    %108 = arith.addf %106, %107 : vector<8x32xf32>
    %c0_85 = arith.constant 0 : index
    %c8_86 = arith.constant 8 : index
    %c13 = arith.constant 13 : index
    %c0_87 = arith.constant 0 : index
    %109 = vector.load %arg6[%c0_85, %c8_86, %c13, %c0_87] : memref<1x16x32x32xf32, #tpu.memory_space<vmem>>, vector<1x8x1x32xf32>
    %110 = vector.shape_cast %109 : vector<1x8x1x32xf32> to vector<8x32xf32>
    %111 = vector.shape_cast %108 : vector<8x32xf32> to vector<1x8x1x32xf32>
    tpu.vector_store %arg6[%c0_85, %c8_86, %c13, %c0_87], %111 {strides = array<i32>} : memref<1x16x32x32xf32, #tpu.memory_space<vmem>>, vector<1x8x1x32xf32>,
    %c0_88 = arith.constant 0 : index
    %c7_89 = arith.constant 7 : index
    %c0_90 = arith.constant 0 : index
    %c0_91 = arith.constant 0 : index
    %112 = vector.load %arg5[%c0_88, %c7_89, %c0_90, %c0_91] : memref<1x16x8x32xf32, #tpu.memory_space<vmem>>, vector<1x1x8x32xf32>
    %113 = vector.shape_cast %112 : vector<1x1x8x32xf32> to vector<8x32xf32>
    %cst_92 = arith.constant dense<0.000000e+00> : vector<16x32xf32>
    %114 = tpu.matmul %5, %113, %cst_92 {dimension_numbers = #tpu.dot_dimension_numbers<[1], [0], [0], [1], [0, 0, 1, 1], [], []>} : vector<16x8xf32>, vector<8x32xf32>, vector<16x32xf32> -> vector<16x32xf32>
    %115 = vector.extract_strided_slice %114 {offsets = [0, 0], sizes = [8, 32], strides = [1, 1]} : vector<16x32xf32> to vector<8x32xf32>
    %116 = vector.broadcast %6 : vector<8x1xf32> to vector<8x32xf32>
    %117 = arith.addf %115, %116 : vector<8x32xf32>
    %c0_93 = arith.constant 0 : index
    %c8_94 = arith.constant 8 : index
    %c14 = arith.constant 14 : index
    %c0_95 = arith.constant 0 : index
    %118 = vector.load %arg6[%c0_93, %c8_94, %c14, %c0_95] : memref<1x16x32x32xf32, #tpu.memory_space<vmem>>, vector<1x8x1x32xf32>
    %119 = vector.shape_cast %118 : vector<1x8x1x32xf32> to vector<8x32xf32>
    %120 = vector.shape_cast %117 : vector<8x32xf32> to vector<1x8x1x32xf32>
    tpu.vector_store %arg6[%c0_93, %c8_94, %c14, %c0_95], %120 {strides = array<i32>} : memref<1x16x32x32xf32, #tpu.memory_space<vmem>>, vector<1x8x1x32xf32>,
    %121 = vector.extract_strided_slice %114 {offsets = [8, 0], sizes = [8, 32], strides = [1, 1]} : vector<16x32xf32> to vector<8x32xf32>
    %122 = vector.broadcast %6 : vector<8x1xf32> to vector<8x32xf32>
    %123 = arith.addf %121, %122 : vector<8x32xf32>
    %c0_96 = arith.constant 0 : index
    %c8_97 = arith.constant 8 : index
    %c15 = arith.constant 15 : index
    %c0_98 = arith.constant 0 : index
    %124 = vector.load %arg6[%c0_96, %c8_97, %c15, %c0_98] : memref<1x16x32x32xf32, #tpu.memory_space<vmem>>, vector<1x8x1x32xf32>
    %125 = vector.shape_cast %124 : vector<1x8x1x32xf32> to vector<8x32xf32>
    %126 = vector.shape_cast %123 : vector<8x32xf32> to vector<1x8x1x32xf32>
    tpu.vector_store %arg6[%c0_96, %c8_97, %c15, %c0_98], %126 {strides = array<i32>} : memref<1x16x32x32xf32, #tpu.memory_space<vmem>>, vector<1x8x1x32xf32>,
    %c0_99 = arith.constant 0 : index
    %c8_100 = arith.constant 8 : index
    %c0_101 = arith.constant 0 : index
    %c0_102 = arith.constant 0 : index
    %127 = vector.load %arg5[%c0_99, %c8_100, %c0_101, %c0_102] : memref<1x16x8x32xf32, #tpu.memory_space<vmem>>, vector<1x1x8x32xf32>
    %128 = vector.shape_cast %127 : vector<1x1x8x32xf32> to vector<8x32xf32>
    %cst_103 = arith.constant dense<0.000000e+00> : vector<16x32xf32>
    %129 = tpu.matmul %5, %128, %cst_103 {dimension_numbers = #tpu.dot_dimension_numbers<[1], [0], [0], [1], [0, 0, 1, 1], [], []>} : vector<16x8xf32>, vector<8x32xf32>, vector<16x32xf32> -> vector<16x32xf32>
    %130 = vector.extract_strided_slice %129 {offsets = [0, 0], sizes = [8, 32], strides = [1, 1]} : vector<16x32xf32> to vector<8x32xf32>
    %131 = vector.broadcast %6 : vector<8x1xf32> to vector<8x32xf32>
    %132 = arith.addf %130, %131 : vector<8x32xf32>
    %c0_104 = arith.constant 0 : index
    %c8_105 = arith.constant 8 : index
    %c16 = arith.constant 16 : index
    %c0_106 = arith.constant 0 : index
    %133 = vector.load %arg6[%c0_104, %c8_105, %c16, %c0_106] : memref<1x16x32x32xf32, #tpu.memory_space<vmem>>, vector<1x8x1x32xf32>
    %134 = vector.shape_cast %133 : vector<1x8x1x32xf32> to vector<8x32xf32>
    %135 = vector.shape_cast %132 : vector<8x32xf32> to vector<1x8x1x32xf32>
    tpu.vector_store %arg6[%c0_104, %c8_105, %c16, %c0_106], %135 {strides = array<i32>} : memref<1x16x32x32xf32, #tpu.memory_space<vmem>>, vector<1x8x1x32xf32>,
    %136 = vector.extract_strided_slice %129 {offsets = [8, 0], sizes = [8, 32], strides = [1, 1]} : vector<16x32xf32> to vector<8x32xf32>
    %137 = vector.broadcast %6 : vector<8x1xf32> to vector<8x32xf32>
    %138 = arith.addf %136, %137 : vector<8x32xf32>
    %c0_107 = arith.constant 0 : index
    %c8_108 = arith.constant 8 : index
    %c17 = arith.constant 17 : index
    %c0_109 = arith.constant 0 : index
    %139 = vector.load %arg6[%c0_107, %c8_108, %c17, %c0_109] : memref<1x16x32x32xf32, #tpu.memory_space<vmem>>, vector<1x8x1x32xf32>
    %140 = vector.shape_cast %139 : vector<1x8x1x32xf32> to vector<8x32xf32>
    %141 = vector.shape_cast %138 : vector<8x32xf32> to vector<1x8x1x32xf32>
    tpu.vector_store %arg6[%c0_107, %c8_108, %c17, %c0_109], %141 {strides = array<i32>} : memref<1x16x32x32xf32, #tpu.memory_space<vmem>>, vector<1x8x1x32xf32>,
    %c0_110 = arith.constant 0 : index
    %c9_111 = arith.constant 9 : index
    %c0_112 = arith.constant 0 : index
    %c0_113 = arith.constant 0 : index
    %142 = vector.load %arg5[%c0_110, %c9_111, %c0_112, %c0_113] : memref<1x16x8x32xf32, #tpu.memory_space<vmem>>, vector<1x1x8x32xf32>
    %143 = vector.shape_cast %142 : vector<1x1x8x32xf32> to vector<8x32xf32>
    %cst_114 = arith.constant dense<0.000000e+00> : vector<16x32xf32>
    %144 = tpu.matmul %5, %143, %cst_114 {dimension_numbers = #tpu.dot_dimension_numbers<[1], [0], [0], [1], [0, 0, 1, 1], [], []>} : vector<16x8xf32>, vector<8x32xf32>, vector<16x32xf32> -> vector<16x32xf32>
    %145 = vector.extract_strided_slice %144 {offsets = [0, 0], sizes = [8, 32], strides = [1, 1]} : vector<16x32xf32> to vector<8x32xf32>
    %146 = vector.broadcast %6 : vector<8x1xf32> to vector<8x32xf32>
    %147 = arith.addf %145, %146 : vector<8x32xf32>
    %c0_115 = arith.constant 0 : index
    %c8_116 = arith.constant 8 : index
    %c18 = arith.constant 18 : index
    %c0_117 = arith.constant 0 : index
    %148 = vector.load %arg6[%c0_115, %c8_116, %c18, %c0_117] : memref<1x16x32x32xf32, #tpu.memory_space<vmem>>, vector<1x8x1x32xf32>
    %149 = vector.shape_cast %148 : vector<1x8x1x32xf32> to vector<8x32xf32>
    %150 = vector.shape_cast %147 : vector<8x32xf32> to vector<1x8x1x32xf32>
    tpu.vector_store %arg6[%c0_115, %c8_116, %c18, %c0_117], %150 {strides = array<i32>} : memref<1x16x32x32xf32, #tpu.memory_space<vmem>>, vector<1x8x1x32xf32>,
    %151 = vector.extract_strided_slice %144 {offsets = [8, 0], sizes = [8, 32], strides = [1, 1]} : vector<16x32xf32> to vector<8x32xf32>
    %152 = vector.broadcast %6 : vector<8x1xf32> to vector<8x32xf32>
    %153 = arith.addf %151, %152 : vector<8x32xf32>
    %c0_118 = arith.constant 0 : index
    %c8_119 = arith.constant 8 : index
    %c19 = arith.constant 19 : index
    %c0_120 = arith.constant 0 : index
    %154 = vector.load %arg6[%c0_118, %c8_119, %c19, %c0_120] : memref<1x16x32x32xf32, #tpu.memory_space<vmem>>, vector<1x8x1x32xf32>
    %155 = vector.shape_cast %154 : vector<1x8x1x32xf32> to vector<8x32xf32>
    %156 = vector.shape_cast %153 : vector<8x32xf32> to vector<1x8x1x32xf32>
    tpu.vector_store %arg6[%c0_118, %c8_119, %c19, %c0_120], %156 {strides = array<i32>} : memref<1x16x32x32xf32, #tpu.memory_space<vmem>>, vector<1x8x1x32xf32>,
    %c0_121 = arith.constant 0 : index
    %c10_122 = arith.constant 10 : index
    %c0_123 = arith.constant 0 : index
    %c0_124 = arith.constant 0 : index
    %157 = vector.load %arg5[%c0_121, %c10_122, %c0_123, %c0_124] : memref<1x16x8x32xf32, #tpu.memory_space<vmem>>, vector<1x1x8x32xf32>
    %158 = vector.shape_cast %157 : vector<1x1x8x32xf32> to vector<8x32xf32>
    %cst_125 = arith.constant dense<0.000000e+00> : vector<16x32xf32>
    %159 = tpu.matmul %5, %158, %cst_125 {dimension_numbers = #tpu.dot_dimension_numbers<[1], [0], [0], [1], [0, 0, 1, 1], [], []>} : vector<16x8xf32>, vector<8x32xf32>, vector<16x32xf32> -> vector<16x32xf32>
    %160 = vector.extract_strided_slice %159 {offsets = [0, 0], sizes = [8, 32], strides = [1, 1]} : vector<16x32xf32> to vector<8x32xf32>
    %161 = vector.broadcast %6 : vector<8x1xf32> to vector<8x32xf32>
    %162 = arith.addf %160, %161 : vector<8x32xf32>
    %c0_126 = arith.constant 0 : index
    %c8_127 = arith.constant 8 : index
    %c20 = arith.constant 20 : index
    %c0_128 = arith.constant 0 : index
    %163 = vector.load %arg6[%c0_126, %c8_127, %c20, %c0_128] : memref<1x16x32x32xf32, #tpu.memory_space<vmem>>, vector<1x8x1x32xf32>
    %164 = vector.shape_cast %163 : vector<1x8x1x32xf32> to vector<8x32xf32>
    %165 = vector.shape_cast %162 : vector<8x32xf32> to vector<1x8x1x32xf32>
    tpu.vector_store %arg6[%c0_126, %c8_127, %c20, %c0_128], %165 {strides = array<i32>} : memref<1x16x32x32xf32, #tpu.memory_space<vmem>>, vector<1x8x1x32xf32>,
    %166 = vector.extract_strided_slice %159 {offsets = [8, 0], sizes = [8, 32], strides = [1, 1]} : vector<16x32xf32> to vector<8x32xf32>
    %167 = vector.broadcast %6 : vector<8x1xf32> to vector<8x32xf32>
    %168 = arith.addf %166, %167 : vector<8x32xf32>
    %c0_129 = arith.constant 0 : index
    %c8_130 = arith.constant 8 : index
    %c21 = arith.constant 21 : index
    %c0_131 = arith.constant 0 : index
    %169 = vector.load %arg6[%c0_129, %c8_130, %c21, %c0_131] : memref<1x16x32x32xf32, #tpu.memory_space<vmem>>, vector<1x8x1x32xf32>
    %170 = vector.shape_cast %169 : vector<1x8x1x32xf32> to vector<8x32xf32>
    %171 = vector.shape_cast %168 : vector<8x32xf32> to vector<1x8x1x32xf32>
    tpu.vector_store %arg6[%c0_129, %c8_130, %c21, %c0_131], %171 {strides = array<i32>} : memref<1x16x32x32xf32, #tpu.memory_space<vmem>>, vector<1x8x1x32xf32>,
    %c0_132 = arith.constant 0 : index
    %c11_133 = arith.constant 11 : index
    %c0_134 = arith.constant 0 : index
    %c0_135 = arith.constant 0 : index
    %172 = vector.load %arg5[%c0_132, %c11_133, %c0_134, %c0_135] : memref<1x16x8x32xf32, #tpu.memory_space<vmem>>, vector<1x1x8x32xf32>
    %173 = vector.shape_cast %172 : vector<1x1x8x32xf32> to vector<8x32xf32>
    %cst_136 = arith.constant dense<0.000000e+00> : vector<16x32xf32>
    %174 = tpu.matmul %5, %173, %cst_136 {dimension_numbers = #tpu.dot_dimension_numbers<[1], [0], [0], [1], [0, 0, 1, 1], [], []>} : vector<16x8xf32>, vector<8x32xf32>, vector<16x32xf32> -> vector<16x32xf32>
    %175 = vector.extract_strided_slice %174 {offsets = [0, 0], sizes = [8, 32], strides = [1, 1]} : vector<16x32xf32> to vector<8x32xf32>
    %176 = vector.broadcast %6 : vector<8x1xf32> to vector<8x32xf32>
    %177 = arith.addf %175, %176 : vector<8x32xf32>
    %c0_137 = arith.constant 0 : index
    %c8_138 = arith.constant 8 : index
    %c22 = arith.constant 22 : index
    %c0_139 = arith.constant 0 : index
    %178 = vector.load %arg6[%c0_137, %c8_138, %c22, %c0_139] : memref<1x16x32x32xf32, #tpu.memory_space<vmem>>, vector<1x8x1x32xf32>
    %179 = vector.shape_cast %178 : vector<1x8x1x32xf32> to vector<8x32xf32>
    %180 = vector.shape_cast %177 : vector<8x32xf32> to vector<1x8x1x32xf32>
    tpu.vector_store %arg6[%c0_137, %c8_138, %c22, %c0_139], %180 {strides = array<i32>} : memref<1x16x32x32xf32, #tpu.memory_space<vmem>>, vector<1x8x1x32xf32>,
    %181 = vector.extract_strided_slice %174 {offsets = [8, 0], sizes = [8, 32], strides = [1, 1]} : vector<16x32xf32> to vector<8x32xf32>
    %182 = vector.broadcast %6 : vector<8x1xf32> to vector<8x32xf32>
    %183 = arith.addf %181, %182 : vector<8x32xf32>
    %c0_140 = arith.constant 0 : index
    %c8_141 = arith.constant 8 : index
    %c23 = arith.constant 23 : index
    %c0_142 = arith.constant 0 : index
    %184 = vector.load %arg6[%c0_140, %c8_141, %c23, %c0_142] : memref<1x16x32x32xf32, #tpu.memory_space<vmem>>, vector<1x8x1x32xf32>
    %185 = vector.shape_cast %184 : vector<1x8x1x32xf32> to vector<8x32xf32>
    %186 = vector.shape_cast %183 : vector<8x32xf32> to vector<1x8x1x32xf32>
    tpu.vector_store %arg6[%c0_140, %c8_141, %c23, %c0_142], %186 {strides = array<i32>} : memref<1x16x32x32xf32, #tpu.memory_space<vmem>>, vector<1x8x1x32xf32>,
    %c0_143 = arith.constant 0 : index
    %c12_144 = arith.constant 12 : index
    %c0_145 = arith.constant 0 : index
    %c0_146 = arith.constant 0 : index
    %187 = vector.load %arg5[%c0_143, %c12_144, %c0_145, %c0_146] : memref<1x16x8x32xf32, #tpu.memory_space<vmem>>, vector<1x1x8x32xf32>
    %188 = vector.shape_cast %187 : vector<1x1x8x32xf32> to vector<8x32xf32>
    %cst_147 = arith.constant dense<0.000000e+00> : vector<16x32xf32>
    %189 = tpu.matmul %5, %188, %cst_147 {dimension_numbers = #tpu.dot_dimension_numbers<[1], [0], [0], [1], [0, 0, 1, 1], [], []>} : vector<16x8xf32>, vector<8x32xf32>, vector<16x32xf32> -> vector<16x32xf32>
    %190 = vector.extract_strided_slice %189 {offsets = [0, 0], sizes = [8, 32], strides = [1, 1]} : vector<16x32xf32> to vector<8x32xf32>
    %191 = vector.broadcast %6 : vector<8x1xf32> to vector<8x32xf32>
    %192 = arith.addf %190, %191 : vector<8x32xf32>
    %c0_148 = arith.constant 0 : index
    %c8_149 = arith.constant 8 : index
    %c24 = arith.constant 24 : index
    %c0_150 = arith.constant 0 : index
    %193 = vector.load %arg6[%c0_148, %c8_149, %c24, %c0_150] : memref<1x16x32x32xf32, #tpu.memory_space<vmem>>, vector<1x8x1x32xf32>
    %194 = vector.shape_cast %193 : vector<1x8x1x32xf32> to vector<8x32xf32>
    %195 = vector.shape_cast %192 : vector<8x32xf32> to vector<1x8x1x32xf32>
    tpu.vector_store %arg6[%c0_148, %c8_149, %c24, %c0_150], %195 {strides = array<i32>} : memref<1x16x32x32xf32, #tpu.memory_space<vmem>>, vector<1x8x1x32xf32>,
    %196 = vector.extract_strided_slice %189 {offsets = [8, 0], sizes = [8, 32], strides = [1, 1]} : vector<16x32xf32> to vector<8x32xf32>
    %197 = vector.broadcast %6 : vector<8x1xf32> to vector<8x32xf32>
    %198 = arith.addf %196, %197 : vector<8x32xf32>
    %c0_151 = arith.constant 0 : index
    %c8_152 = arith.constant 8 : index
    %c25 = arith.constant 25 : index
    %c0_153 = arith.constant 0 : index
    %199 = vector.load %arg6[%c0_151, %c8_152, %c25, %c0_153] : memref<1x16x32x32xf32, #tpu.memory_space<vmem>>, vector<1x8x1x32xf32>
    %200 = vector.shape_cast %199 : vector<1x8x1x32xf32> to vector<8x32xf32>
    %201 = vector.shape_cast %198 : vector<8x32xf32> to vector<1x8x1x32xf32>
    tpu.vector_store %arg6[%c0_151, %c8_152, %c25, %c0_153], %201 {strides = array<i32>} : memref<1x16x32x32xf32, #tpu.memory_space<vmem>>, vector<1x8x1x32xf32>,
    %c0_154 = arith.constant 0 : index
    %c13_155 = arith.constant 13 : index
    %c0_156 = arith.constant 0 : index
    %c0_157 = arith.constant 0 : index
    %202 = vector.load %arg5[%c0_154, %c13_155, %c0_156, %c0_157] : memref<1x16x8x32xf32, #tpu.memory_space<vmem>>, vector<1x1x8x32xf32>
    %203 = vector.shape_cast %202 : vector<1x1x8x32xf32> to vector<8x32xf32>
    %cst_158 = arith.constant dense<0.000000e+00> : vector<16x32xf32>
    %204 = tpu.matmul %5, %203, %cst_158 {dimension_numbers = #tpu.dot_dimension_numbers<[1], [0], [0], [1], [0, 0, 1, 1], [], []>} : vector<16x8xf32>, vector<8x32xf32>, vector<16x32xf32> -> vector<16x32xf32>
    %205 = vector.extract_strided_slice %204 {offsets = [0, 0], sizes = [8, 32], strides = [1, 1]} : vector<16x32xf32> to vector<8x32xf32>
    %206 = vector.broadcast %6 : vector<8x1xf32> to vector<8x32xf32>
    %207 = arith.addf %205, %206 : vector<8x32xf32>
    %c0_159 = arith.constant 0 : index
    %c8_160 = arith.constant 8 : index
    %c26 = arith.constant 26 : index
    %c0_161 = arith.constant 0 : index
    %208 = vector.load %arg6[%c0_159, %c8_160, %c26, %c0_161] : memref<1x16x32x32xf32, #tpu.memory_space<vmem>>, vector<1x8x1x32xf32>
    %209 = vector.shape_cast %208 : vector<1x8x1x32xf32> to vector<8x32xf32>
    %210 = vector.shape_cast %207 : vector<8x32xf32> to vector<1x8x1x32xf32>
    tpu.vector_store %arg6[%c0_159, %c8_160, %c26, %c0_161], %210 {strides = array<i32>} : memref<1x16x32x32xf32, #tpu.memory_space<vmem>>, vector<1x8x1x32xf32>,
    %211 = vector.extract_strided_slice %204 {offsets = [8, 0], sizes = [8, 32], strides = [1, 1]} : vector<16x32xf32> to vector<8x32xf32>
    %212 = vector.broadcast %6 : vector<8x1xf32> to vector<8x32xf32>
    %213 = arith.addf %211, %212 : vector<8x32xf32>
    %c0_162 = arith.constant 0 : index
    %c8_163 = arith.constant 8 : index
    %c27 = arith.constant 27 : index
    %c0_164 = arith.constant 0 : index
    %214 = vector.load %arg6[%c0_162, %c8_163, %c27, %c0_164] : memref<1x16x32x32xf32, #tpu.memory_space<vmem>>, vector<1x8x1x32xf32>
    %215 = vector.shape_cast %214 : vector<1x8x1x32xf32> to vector<8x32xf32>
    %216 = vector.shape_cast %213 : vector<8x32xf32> to vector<1x8x1x32xf32>
    tpu.vector_store %arg6[%c0_162, %c8_163, %c27, %c0_164], %216 {strides = array<i32>} : memref<1x16x32x32xf32, #tpu.memory_space<vmem>>, vector<1x8x1x32xf32>,
    %c0_165 = arith.constant 0 : index
    %c14_166 = arith.constant 14 : index
    %c0_167 = arith.constant 0 : index
    %c0_168 = arith.constant 0 : index
    %217 = vector.load %arg5[%c0_165, %c14_166, %c0_167, %c0_168] : memref<1x16x8x32xf32, #tpu.memory_space<vmem>>, vector<1x1x8x32xf32>
    %218 = vector.shape_cast %217 : vector<1x1x8x32xf32> to vector<8x32xf32>
    %cst_169 = arith.constant dense<0.000000e+00> : vector<16x32xf32>
    %219 = tpu.matmul %5, %218, %cst_169 {dimension_numbers = #tpu.dot_dimension_numbers<[1], [0], [0], [1], [0, 0, 1, 1], [], []>} : vector<16x8xf32>, vector<8x32xf32>, vector<16x32xf32> -> vector<16x32xf32>
    %220 = vector.extract_strided_slice %219 {offsets = [0, 0], sizes = [8, 32], strides = [1, 1]} : vector<16x32xf32> to vector<8x32xf32>
    %221 = vector.broadcast %6 : vector<8x1xf32> to vector<8x32xf32>
    %222 = arith.addf %220, %221 : vector<8x32xf32>
    %c0_170 = arith.constant 0 : index
    %c8_171 = arith.constant 8 : index
    %c28 = arith.constant 28 : index
    %c0_172 = arith.constant 0 : index
    %223 = vector.load %arg6[%c0_170, %c8_171, %c28, %c0_172] : memref<1x16x32x32xf32, #tpu.memory_space<vmem>>, vector<1x8x1x32xf32>
    %224 = vector.shape_cast %223 : vector<1x8x1x32xf32> to vector<8x32xf32>
    %225 = vector.shape_cast %222 : vector<8x32xf32> to vector<1x8x1x32xf32>
    tpu.vector_store %arg6[%c0_170, %c8_171, %c28, %c0_172], %225 {strides = array<i32>} : memref<1x16x32x32xf32, #tpu.memory_space<vmem>>, vector<1x8x1x32xf32>,
    %226 = vector.extract_strided_slice %219 {offsets = [8, 0], sizes = [8, 32], strides = [1, 1]} : vector<16x32xf32> to vector<8x32xf32>
    %227 = vector.broadcast %6 : vector<8x1xf32> to vector<8x32xf32>
    %228 = arith.addf %226, %227 : vector<8x32xf32>
    %c0_173 = arith.constant 0 : index
    %c8_174 = arith.constant 8 : index
    %c29 = arith.constant 29 : index
    %c0_175 = arith.constant 0 : index
    %229 = vector.load %arg6[%c0_173, %c8_174, %c29, %c0_175] : memref<1x16x32x32xf32, #tpu.memory_space<vmem>>, vector<1x8x1x32xf32>
    %230 = vector.shape_cast %229 : vector<1x8x1x32xf32> to vector<8x32xf32>
    %231 = vector.shape_cast %228 : vector<8x32xf32> to vector<1x8x1x32xf32>
    tpu.vector_store %arg6[%c0_173, %c8_174, %c29, %c0_175], %231 {strides = array<i32>} : memref<1x16x32x32xf32, #tpu.memory_space<vmem>>, vector<1x8x1x32xf32>,
    %c0_176 = arith.constant 0 : index
    %c15_177 = arith.constant 15 : index
    %c0_178 = arith.constant 0 : index
    %c0_179 = arith.constant 0 : index
    %232 = vector.load %arg5[%c0_176, %c15_177, %c0_178, %c0_179] : memref<1x16x8x32xf32, #tpu.memory_space<vmem>>, vector<1x1x8x32xf32>
    %233 = vector.shape_cast %232 : vector<1x1x8x32xf32> to vector<8x32xf32>
    %cst_180 = arith.constant dense<0.000000e+00> : vector<16x32xf32>
    %234 = tpu.matmul %5, %233, %cst_180 {dimension_numbers = #tpu.dot_dimension_numbers<[1], [0], [0], [1], [0, 0, 1, 1], [], []>} : vector<16x8xf32>, vector<8x32xf32>, vector<16x32xf32> -> vector<16x32xf32>
    %235 = vector.extract_strided_slice %234 {offsets = [0, 0], sizes = [8, 32], strides = [1, 1]} : vector<16x32xf32> to vector<8x32xf32>
    %236 = vector.broadcast %6 : vector<8x1xf32> to vector<8x32xf32>
    %237 = arith.addf %235, %236 : vector<8x32xf32>
    %c0_181 = arith.constant 0 : index
    %c8_182 = arith.constant 8 : index
    %c30 = arith.constant 30 : index
    %c0_183 = arith.constant 0 : index
    %238 = vector.load %arg6[%c0_181, %c8_182, %c30, %c0_183] : memref<1x16x32x32xf32, #tpu.memory_space<vmem>>, vector<1x8x1x32xf32>
    %239 = vector.shape_cast %238 : vector<1x8x1x32xf32> to vector<8x32xf32>
    %240 = vector.shape_cast %237 : vector<8x32xf32> to vector<1x8x1x32xf32>
    tpu.vector_store %arg6[%c0_181, %c8_182, %c30, %c0_183], %240 {strides = array<i32>} : memref<1x16x32x32xf32, #tpu.memory_space<vmem>>, vector<1x8x1x32xf32>,
    %241 = vector.extract_strided_slice %234 {offsets = [8, 0], sizes = [8, 32], strides = [1, 1]} : vector<16x32xf32> to vector<8x32xf32>
    %242 = vector.broadcast %6 : vector<8x1xf32> to vector<8x32xf32>
    %243 = arith.addf %241, %242 : vector<8x32xf32>
    %c0_184 = arith.constant 0 : index
    %c8_185 = arith.constant 8 : index
    %c31 = arith.constant 31 : index
    %c0_186 = arith.constant 0 : index
    %244 = vector.load %arg6[%c0_184, %c8_185, %c31, %c0_186] : memref<1x16x32x32xf32, #tpu.memory_space<vmem>>, vector<1x8x1x32xf32>
    %245 = vector.shape_cast %244 : vector<1x8x1x32xf32> to vector<8x32xf32>
    %246 = vector.shape_cast %243 : vector<8x32xf32> to vector<1x8x1x32xf32>
    tpu.vector_store %arg6[%c0_184, %c8_185, %c31, %c0_186], %246 {strides = array<i32>} : memref<1x16x32x32xf32, #tpu.memory_space<vmem>>, vector<1x8x1x32xf32>,
    return
  }
  func.func @transform_0(%arg0: i32, %arg1: i32) -> (i32, i32) {
    %c0_i32 = arith.constant 0 : i32
    %c0_i32_0 = arith.constant 0 : i32
    %c0_i32_1 = arith.constant 0 : i32
    return %c0_i32, %c0_i32_0 : i32, i32
  }
  func.func @transform_1(%arg0: i32, %arg1: i32) -> (i32, i32) {
    %c0_i32 = arith.constant 0 : i32
    %c0_i32_0 = arith.constant 0 : i32
    %c0_i32_1 = arith.constant 0 : i32
    return %c0_i32, %c0_i32_0 : i32, i32
  }
  func.func @transform_2(%arg0: i32, %arg1: i32) -> (i32, i32, i32, i32) {
    %c0_i32 = arith.constant 0 : i32
    %c0_i32_0 = arith.constant 0 : i32
    %c0_i32_1 = arith.constant 0 : i32
    return %arg0, %c0_i32, %arg1, %c0_i32_0 : i32, i32, i32, i32
  }
  func.func @transform_3(%arg0: i32, %arg1: i32) -> (i32, i32, i32, i32) {
    %c0_i32 = arith.constant 0 : i32
    %c0_i32_0 = arith.constant 0 : i32
    %c0_i32_1 = arith.constant 0 : i32
    return %arg0, %arg1, %c0_i32, %c0_i32_0 : i32, i32, i32, i32
  }
  func.func @transform_4(%arg0: i32, %arg1: i32) -> (i32, i32, i32, i32) {
    %c0_i32 = arith.constant 0 : i32
    %c0_i32_0 = arith.constant 0 : i32
    %c0_i32_1 = arith.constant 0 : i32
    return %arg0, %c0_i32, %arg1, %c0_i32_0 : i32, i32, i32, i32
  }
}

</mosaic_0001>

<bundles_post_ra>
// kernel: cross_conv.1
= control target key start
LH: loop header
LB: loop body
LE: loop exit
PB: predicated region body
PF: predicated region fallthrough
CT: control target
= control target key end

     0   :  { %9 = vsyncpa [#allocation3], 0  ;;  %s5613_s0 = inlined_call_operand.vmem [shape: f32[16,8], index: 0, kind: input, shape index: {}]   ;;  %s5614_s1 = inlined_call_operand.vmem [shape: f32[8,1], index: 1, kind: input, shape index: {}]   ;;  %s5615_s2 = inlined_call_operand.vmem [shape: f32[2,8,32,32], index: 2, kind: input, shape index: {}]   ;;  %s5616_s3 = inlined_call_operand.vmem [shape: f32[2,16,8,32], index: 3, kind: input, shape index: {}]   ;;  %s5617_s4 = inlined_call_operand.hbm [shape: f32[2,16,32,32], index: 4, kind: output, shape index: {}]  }
   0x1   :  { %11 = vsyncpa [#allocation3 + $0x1], 0  ;;  %s4452_s15 = smov 0   ;;  %s4454_s16 = smov 0  }
   0x2   :  { %s4456_s17 = smov 0   ;;  %s4458_s18 = smov 0  }
   0x3   :  { %s4460_s19 = smov 0   ;;  %s4462_s20 = smov 0  }
   0x4 LB: > { %s3833_s21 = sadd.s32 4294967295, %s4420_s20   ;;  %s3834_s22 = sadd.s32 4294967294, %s4420_s20   ;;  %s4420_s20 = sphi %s4462_s20, %s17_s20   ;;  %s4416_s19 = sphi %s4460_s19, %s5624_s19   ;;  %s4412_s18 = sphi %s4458_s18, %s5623_s18   ;;  %s4408_s17 = sphi %s4456_s17, %s5622_s17   ;;  %s4404_s16 = sphi %s4454_s16, %s5621_s16   ;;  %s4400_s15 = sphi %s4452_s15, %s5620_s15  }
   0x5   : > { %s29_s23 = sadd.s32 1, %s4416_s19  ;;  %s136_s24 = sadd.s32 1, %s4408_s17 }
   0x6   : > { %p31_p0 = scmp.ge.s32.totalorder %s29_s23, 2  ;;  %p146_p1 = scmp.ne.s32.totalorder %s4408_s17, %s4404_s16 }
   0x7   : > { %p147_p2 = scmp.eq.s32.totalorder %s3833_s21, 1  ;;  %p152_p3 = scmp.ne.s32.totalorder %s4404_s16, %s4400_s15 }
   0x8   : > { %s5626_s23 = smov (%p31_p0, %s29_s23), 0  ;;  %p153_p5 = scmp.eq.s32.totalorder %s3834_s22, 1 }
   0x9   : > { %p4492_p4 = por %p147_p2, %p146_p1  ;;  %s131_s26 = ssub.s32 %s4416_s19, %s5626_s23 }
   0xa   : > { %p3837_p6 = scmp.ge.s32.totalorder %s4420_s20, 1  ;;  %p134_p7 = scmp.eq.s32.totalorder %s131_s26, 0 }
   0xb   : > { %p4499_p8 = por %p153_p5, %p152_p3  ;;  %p203_p9 = scmp.lt.s32.totalorder %s4420_s20, 3 }
   0xc   : > { %s4505_s28 = scalar_select %p134_p7, %s4408_s17, %s136_s24  }
   0xd   : > { %p204_p10 = pnand %p3837_p6, %p203_p9 }
   0xe   : > { %p243_p11 = scmp.lt.s32.totalorder (!%p204_p10), %s4412_s18, 1  ;;  %v4511_v0 = vld [vmem:[%s5613_s0] sm:$0xff] (!%p204_p10)  ;;  %vm332_vm0 = vcmask (!%p204_p10), 64512   ;;  %v4422_v2 = vmov (!%p204_p10), 0   ;;  %v4534_v5 = vld [vmem:[%s5613_s0 + $0x8] sm:$0xff] (!%p204_p10)  ;;  %s239_s21 = sand.u32 (!%p204_p10), 1, %s4404_s16   ;;  %v425_v28 = vlaneseq (!%p204_p10) }
   0xf   : > { %207 = sbr.rel (%p204_p10) target bundleno = 401 (0x191), region = 36  ;;  %v330_v1 = vld [vmem:[%s5614_s1] sm:$0xff] (!%p204_p10)  ;;  %4204 = vmatprep.mubr.msk.f32.mxu0 (!%p204_p10), %vm332_vm0, %v4511_v0  ;;  %4209 = vmatprep.mubr.msk.f32.mxu1 (!%p204_p10), %vm332_vm0, %v4511_v0  ;;  %s3838_s29 = sshll.u32 (!%p204_p10), %s239_s21, 9  ;;  %vm295_vm1 = vcmask (!%p204_p10), 261120   ;;  %v4423_v26 = vmov (!%p204_p10), 1966171168  }
  0x10   : > { %4341 = vset.pattern.permute.xlu0 (!%p204_p10), %v4422_v2  ;;  %s4625_s30 = scalar_lea.vmem (!%p204_p10), [#allocation2], %s3838_s29  ;;  %v423_v27 = vunpack.c.l.s4 (!%p204_p10), %v4423_v26  ;;  %v426_v42 = vshrl.u32 (!%p204_p10), %v425_v28, 7  ;;  %vm479_vm2 = vcmask (!%p204_p10), 253952   ;;  %s4153_s5 = sshll.u32 (!%p204_p10), %s4412_s18, 13 }
  0x11   : > { %416 = vperm.xlu0 (!%p204_p10), %4341, %v330_v1   ;;  %s3736_s6 = sshll.u32 (!%p204_p10), %s4625_s30, 4  ;;  %s5567_s9 = scalar_lea.sflag (!%p204_p10), [#allocation3], %s239_s21  ;;  %s5555_s6 = int_to_ptr.vmem [resolvable:$true] %s3736_s6 }
  0x12   : > { %v424_v41 = vunpack.c.0.s8 (!%p204_p10), %v423_v27  ;;  %s4342_s10 = scalar_lea.vmem (!%p204_p10), %s5555_s6, 8192 }
  0x13   : > { %p4343_p12 = scmp.ne.s32.totalorder (!%p204_p10), %s5555_s6, %s4342_s10 }
  0x14   : > { %v4707_v56 = vsub.s32 (!%p204_p10), %v424_v41, %v426_v42 }
  0x15   : > { %p4344_p13 = pnand (!%p204_p10), %p4343_p12, %p4492_p4 }
  0x16   : > { %s4521_s7 = scalar_select %p243_p11, %s4412_s18, 1 }
  0x17   : > { %p4345_p0 = pneg %p4344_p13 }
  0x18   : > { %s4152_s8 = sshll.u32 %s4521_s7, 7  ;;  %s4151_s14 = sshll.u32 %s4521_s7, 8 }
  0x19   : > { %s4527_s11 = scalar_lea.vmem %s5616_s3, %s4152_s8  ;;  %s4615_s26 = scalar_lea.vmem %s5615_s2, %s4151_s14 }
  0x1a   : > { %v331_v3 = vld [vmem:[%s4527_s11] sm:$0xff]  ;;  %v3861_v4 = vld [vmem:[%s4527_s11 + $0x8] sm:$0xff]  ;;  %v3880_v6 = vld [vmem:[%s4527_s11 + $0x10] sm:$0xff]  ;;  %s5553_s8 = scalar_lea.hbm %s5617_s4, %s4153_s5 }
  0x1b   : > { %4202 = vmatprep.subr.mxu0 %v331_v3  ;;  %4207 = vmatprep.subr.mxu1 %v3861_v4  ;;  %v3899_v7 = vld [vmem:[%s4527_s11 + $0x18] sm:$0xff]  ;;  %v3918_v8 = vld [vmem:[%s4527_s11 + $0x20] sm:$0xff]  ;;  %v3937_v9 = vld [vmem:[%s4527_s11 + $0x28] sm:$0xff] }
  0x1c   : > { %4203 = vmatpush3.msra.mxu0 %v331_v3  ;;  %4208 = vmatpush3.msra.mxu1 %v3861_v4  ;;  %v3956_v10 = vld [vmem:[%s4527_s11 + $0x30] sm:$0xff]  ;;  %v3975_v11 = vld [vmem:[%s4527_s11 + $0x38] sm:$0xff]  ;;  %v3994_v12 = vld [vmem:[%s4527_s11 + $0x40] sm:$0xff] }
  0x1d   : > { %4205 = vmatmul.mubr.msk.f32.vlgmr.msra.gmra.mrb[0].mxu0 %vm332_vm0, %v4534_v5  ;;  %4210 = vmatmul.mubr.msk.f32.vlgmr.msra.gmra.mrb[0].mxu1 %vm332_vm0, %v4534_v5  ;;  %v4013_v13 = vld [vmem:[%s4527_s11 + $0x48] sm:$0xff]  ;;  %v4032_v14 = vld [vmem:[%s4527_s11 + $0x50] sm:$0xff]  ;;  %v4051_v15 = vld [vmem:[%s4527_s11 + $0x58] sm:$0xff] }
  0x1e   : > { %4212 = vmatprep.subr.mxu0 %v3880_v6  ;;  %4217 = vmatprep.subr.mxu1 %v3899_v7  ;;  %v4070_v16 = vld [vmem:[%s4527_s11 + $0x60] sm:$0xff]  ;;  %v4089_v17 = vld [vmem:[%s4527_s11 + $0x68] sm:$0xff]  ;;  %v4108_v18 = vld [vmem:[%s4527_s11 + $0x70] sm:$0xff] }
  0x1f   : > { %4213 = vmatpush3.msra.mxu0 %v3880_v6  ;;  %4218 = vmatpush3.msra.mxu1 %v3899_v7  ;;  %v4127_v19 = vld [vmem:[%s4527_s11 + $0x78] sm:$0xff]  ;;  %v263_v20 = vld [vmem:[%s4615_s26] sm:$0xff]  ;;  %v264_v21 = vld [vmem:[%s4615_s26 + $0x8] sm:$0xff]  ;;  %s4424_s11 = smov [#allocation2]  }
  0x20   : > { %4214 = vmatprep.mubr.msk.f32.mxu0 %vm332_vm0, %v4511_v0  ;;  %4219 = vmatprep.mubr.msk.f32.mxu1 %vm332_vm0, %v4511_v0  ;;  %v265_v22 = vld [vmem:[%s4615_s26 + $0x10] sm:$0xff]  ;;  %v266_v23 = vld [vmem:[%s4615_s26 + $0x18] sm:$0xff]  ;;  %v267_v24 = vld [vmem:[%s4615_s26 + $0x20] sm:$0xff]  ;;  %296 = vst.msk [vmem:[%s4625_s30] sm:$0xff] %vm295_vm1, %v263_v20  ;;  %s4346_s12 = sshll.u32 %s4424_s11, 4  ;;  %s4347_s12 = int_to_ptr.vmem [resolvable:$false] %s4346_s12 }
  0x21   : > { %4215 = vmatmul.mubr.msk.f32.vlgmr.msra.gmra.mrb[2].mxu0 %vm332_vm0, %v4534_v5  ;;  %4220 = vmatmul.mubr.msk.f32.vlgmr.msra.gmra.mrb[2].mxu1 %vm332_vm0, %v4534_v5  ;;  %v268_v25 = vld [vmem:[%s4615_s26 + $0x28] sm:$0xff]  ;;  %297 = vst.msk [vmem:[%s4625_s30 + $0x8] sm:$0xff] %vm295_vm1, %v264_v21  ;;  %298 = vst.msk [vmem:[%s4625_s30 + $0x10] sm:$0xff] %vm295_vm1, %v265_v22  ;;  %v269_v29 = vld [vmem:[%s4615_s26 + $0x30] sm:$0xff]  ;;  %s4348_s13 = scalar_lea.vmem %s4347_s12, 16384  ;;  %p4349_p1 = scmp.lt.s32.totalorder %s5555_s6, %s4347_s12 }
  0x22   : > { %4222 = vmatprep.subr.mxu0 %v3918_v8  ;;  %4227 = vmatprep.subr.mxu1 %v3937_v9  ;;  %v270_v30 = vld [vmem:[%s4615_s26 + $0x38] sm:$0xff]  ;;  %v271_v31 = vld [vmem:[%s4615_s26 + $0x40] sm:$0xff]  ;;  %299 = vst.msk [vmem:[%s4625_s30 + $0x18] sm:$0xff] %vm295_vm1, %v266_v23  ;;  %300 = vst.msk [vmem:[%s4625_s30 + $0x20] sm:$0xff] %vm295_vm1, %v267_v24  ;;  %p4350_p2 = scmp.lt.s32.totalorder %s4348_s13, %s4342_s10 }
  0x23   : > { %4223 = vmatpush3.msra.mxu0 %v3918_v8  ;;  %4228 = vmatpush3.msra.mxu1 %v3937_v9  ;;  %301 = vst.msk [vmem:[%s4625_s30 + $0x28] sm:$0xff] %vm295_vm1, %v268_v25  ;;  %v272_v32 = vld [vmem:[%s4615_s26 + $0x48] sm:$0xff]  ;;  %v273_v33 = vld [vmem:[%s4615_s26 + $0x50] sm:$0xff]  ;;  %v274_v34 = vld [vmem:[%s4615_s26 + $0x58] sm:$0xff] }
  0x24   : > { %4224 = vmatprep.mubr.msk.f32.mxu0 %vm332_vm0, %v4511_v0  ;;  %4229 = vmatprep.mubr.msk.f32.mxu1 %vm332_vm0, %v4511_v0  ;;  %302 = vst.msk [vmem:[%s4625_s30 + $0x30] sm:$0xff] %vm295_vm1, %v269_v29  ;;  %303 = vst.msk [vmem:[%s4625_s30 + $0x38] sm:$0xff] %vm295_vm1, %v270_v30  ;;  %v275_v35 = vld [vmem:[%s4615_s26 + $0x60] sm:$0xff]  ;;  %v276_v36 = vld [vmem:[%s4615_s26 + $0x68] sm:$0xff]  ;;  %p4351_p3 = por %p4350_p2, %p4349_p1 }
  0x25   : > { %4225 = vmatmul.mubr.msk.f32.vlgmr.msra.gmra.mrb[4].mxu0 %vm332_vm0, %v4534_v5  ;;  %4230 = vmatmul.mubr.msk.f32.vlgmr.msra.gmra.mrb[4].mxu1 %vm332_vm0, %v4534_v5  ;;  %304 = vst.msk [vmem:[%s4625_s30 + $0x40] sm:$0xff] %vm295_vm1, %v271_v31  ;;  %v277_v37 = vld [vmem:[%s4615_s26 + $0x70] sm:$0xff]  ;;  %305 = vst.msk [vmem:[%s4625_s30 + $0x48] sm:$0xff] %vm295_vm1, %v272_v32  ;;  %v278_v38 = vld [vmem:[%s4615_s26 + $0x78] sm:$0xff] }
  0x26   : > { %4232 = vmatprep.subr.mxu0 %v3956_v10  ;;  %4237 = vmatprep.subr.mxu1 %v3975_v11  ;;  %306 = vst.msk [vmem:[%s4625_s30 + $0x50] sm:$0xff] %vm295_vm1, %v273_v33  ;;  %307 = vst.msk [vmem:[%s4625_s30 + $0x58] sm:$0xff] %vm295_vm1, %v274_v34  ;;  %v279_v39 = vld [vmem:[%s4615_s26 + $0x80] sm:$0xff]  ;;  %v280_v40 = vld [vmem:[%s4615_s26 + $0x88] sm:$0xff]  ;;  %p4352_p5 = pnand %p4351_p3, %p4345_p0 }
  0x27   : > { %4233 = vmatpush3.msra.mxu0 %v3956_v10  ;;  %4238 = vmatpush3.msra.mxu1 %v3975_v11  ;;  %308 = vst.msk [vmem:[%s4625_s30 + $0x60] sm:$0xff] %vm295_vm1, %v275_v35  ;;  %309 = vst.msk [vmem:[%s4625_s30 + $0x68] sm:$0xff] %vm295_vm1, %v276_v36  ;;  %v281_v43 = vld [vmem:[%s4615_s26 + $0x90] sm:$0xff]  ;;  %v282_v44 = vld [vmem:[%s4615_s26 + $0x98] sm:$0xff] }
  0x28   : > { %4234 = vmatprep.mubr.msk.f32.mxu0 %vm332_vm0, %v4511_v0  ;;  %4239 = vmatprep.mubr.msk.f32.mxu1 %vm332_vm0, %v4511_v0  ;;  %310 = vst.msk [vmem:[%s4625_s30 + $0x70] sm:$0xff] %vm295_vm1, %v277_v37  ;;  %v283_v45 = vld [vmem:[%s4615_s26 + $0xa0] sm:$0xff]  ;;  %311 = vst.msk [vmem:[%s4625_s30 + $0x78] sm:$0xff] %vm295_vm1, %v278_v38  ;;  %v284_v46 = vld [vmem:[%s4615_s26 + $0xa8] sm:$0xff] }
  0x29   : > { %4235 = vmatmul.mubr.msk.f32.vlgmr.msra.gmra.mrb[6].mxu0 %vm332_vm0, %v4534_v5  ;;  %4240 = vmatmul.mubr.msk.f32.vlgmr.msra.gmra.mrb[6].mxu1 %vm332_vm0, %v4534_v5  ;;  %312 = vst.msk [vmem:[%s4625_s30 + $0x80] sm:$0xff] %vm295_vm1, %v279_v39  ;;  %313 = vst.msk [vmem:[%s4625_s30 + $0x88] sm:$0xff] %vm295_vm1, %v280_v40  ;;  %v285_v47 = vld [vmem:[%s4615_s26 + $0xb0] sm:$0xff]  ;;  %v286_v48 = vld [vmem:[%s4615_s26 + $0xb8] sm:$0xff] }
  0x2a   : > { %4242 = vmatprep.subr.mxu0 %v3994_v12  ;;  %4247 = vmatprep.subr.mxu1 %v4013_v13  ;;  %314 = vst.msk [vmem:[%s4625_s30 + $0x90] sm:$0xff] %vm295_vm1, %v281_v43  ;;  %315 = vst.msk [vmem:[%s4625_s30 + $0x98] sm:$0xff] %vm295_vm1, %v282_v44  ;;  %v287_v49 = vld [vmem:[%s4615_s26 + $0xc0] sm:$0xff]  ;;  %v288_v50 = vld [vmem:[%s4615_s26 + $0xc8] sm:$0xff] }
  0x2b   : > { %4243 = vmatpush3.msra.mxu0 %v3994_v12  ;;  %4248 = vmatpush3.msra.mxu1 %v4013_v13  ;;  %316 = vst.msk [vmem:[%s4625_s30 + $0xa0] sm:$0xff] %vm295_vm1, %v283_v45  ;;  %v289_v51 = vld [vmem:[%s4615_s26 + $0xd0] sm:$0xff]  ;;  %317 = vst.msk [vmem:[%s4625_s30 + $0xa8] sm:$0xff] %vm295_vm1, %v284_v46  ;;  %v290_v53 = vld [vmem:[%s4615_s26 + $0xd8] sm:$0xff] }
  0x2c   : > { %4244 = vmatprep.mubr.msk.f32.mxu0 %vm332_vm0, %v4511_v0  ;;  %4249 = vmatprep.mubr.msk.f32.mxu1 %vm332_vm0, %v4511_v0  ;;  %318 = vst.msk [vmem:[%s4625_s30 + $0xb0] sm:$0xff] %vm295_vm1, %v285_v47  ;;  %319 = vst.msk [vmem:[%s4625_s30 + $0xb8] sm:$0xff] %vm295_vm1, %v286_v48  ;;  %v291_v54 = vld [vmem:[%s4615_s26 + $0xe0] sm:$0xff]  ;;  %v292_v55 = vld [vmem:[%s4615_s26 + $0xe8] sm:$0xff] }
  0x2d   : > { %4245 = vmatmul.mubr.msk.f32.vlgmr.msra.gmra.mrb[8].mxu0 %vm332_vm0, %v4534_v5  ;;  %4250 = vmatmul.mubr.msk.f32.vlgmr.msra.gmra.mrb[8].mxu1 %vm332_vm0, %v4534_v5  ;;  %320 = vst.msk [vmem:[%s4625_s30 + $0xc0] sm:$0xff] %vm295_vm1, %v287_v49  ;;  %321 = vst.msk [vmem:[%s4625_s30 + $0xc8] sm:$0xff] %vm295_vm1, %v288_v50  ;;  %v293_v57 = vld [vmem:[%s4615_s26 + $0xf0] sm:$0xff]  ;;  %v294_v58 = vld [vmem:[%s4615_s26 + $0xf8] sm:$0xff] }
  0x2e   : > { %4252 = vmatprep.subr.mxu0 %v4032_v14  ;;  %4257 = vmatprep.subr.mxu1 %v4051_v15  ;;  %322 = vst.msk [vmem:[%s4625_s30 + $0xd0] sm:$0xff] %vm295_vm1, %v289_v51  ;;  %323 = vst.msk [vmem:[%s4625_s30 + $0xd8] sm:$0xff] %vm295_vm1, %v290_v53 }
  0x2f   : > { %4253 = vmatpush3.msra.mxu0 %v4032_v14  ;;  %4258 = vmatpush3.msra.mxu1 %v4051_v15  ;;  %324 = vst.msk [vmem:[%s4625_s30 + $0xe0] sm:$0xff] %vm295_vm1, %v291_v54  ;;  %325 = vst.msk [vmem:[%s4625_s30 + $0xe8] sm:$0xff] %vm295_vm1, %v292_v55 }
  0x30   : > { %4254 = vmatprep.mubr.msk.f32.mxu0 %vm332_vm0, %v4511_v0  ;;  %4259 = vmatprep.mubr.msk.f32.mxu1 %vm332_vm0, %v4511_v0  ;;  %326 = vst.msk [vmem:[%s4625_s30 + $0xf0] sm:$0xff] %vm295_vm1, %v293_v57  ;;  %327 = vst.msk [vmem:[%s4625_s30 + $0xf8] sm:$0xff] %vm295_vm1, %v294_v58 }
  0x31   : > { %4255 = vmatmul.mubr.msk.f32.vlgmr.msra.gmra.mrb[10].mxu0 %vm332_vm0, %v4534_v5  ;;  %4260 = vmatmul.mubr.msk.f32.vlgmr.msra.gmra.mrb[10].mxu1 %vm332_vm0, %v4534_v5 }
  0x32   : > { %4262 = vmatprep.subr.mxu0 %v4070_v16  ;;  %4267 = vmatprep.subr.mxu1 %v4089_v17 }
  0x33   : > { %4263 = vmatpush3.msra.mxu0 %v4070_v16  ;;  %4268 = vmatpush3.msra.mxu1 %v4089_v17 }
  0x34   : > { %4264 = vmatprep.mubr.msk.f32.mxu0 %vm332_vm0, %v4511_v0  ;;  %4269 = vmatprep.mubr.msk.f32.mxu1 %vm332_vm0, %v4511_v0 }
  0x35   : > { %4265 = vmatmul.mubr.msk.f32.vlgmr.msra.gmra.mrb[12].mxu0 %vm332_vm0, %v4534_v5  ;;  %4270 = vmatmul.mubr.msk.f32.vlgmr.msra.gmra.mrb[12].mxu1 %vm332_vm0, %v4534_v5 }
  0x36   : > { %4272 = vmatprep.subr.mxu0 %v4108_v18  ;;  %4277 = vmatprep.subr.mxu1 %v4127_v19 }
  0x37   : > { %4273 = vmatpush3.msra.mxu0 %v4108_v18  ;;  %4278 = vmatpush3.msra.mxu1 %v4127_v19 }
  0x38   : > { %4274 = vmatprep.mubr.msk.f32.mxu0 %vm332_vm0, %v4511_v0  ;;  %4279 = vmatprep.mubr.msk.f32.mxu1 %vm332_vm0, %v4511_v0 }
  0x39   : > { %4275 = vmatmul.mubr.msk.f32.vlgmr.msra.gmra.mrb[14].mxu0 %vm332_vm0, %v4534_v5  ;;  %4280 = vmatmul.mubr.msk.f32.vlgmr.msra.gmra.mrb[14].mxu1 %vm332_vm0, %v4534_v5 }
  0x90   : > { %v4696_v52 = vpop.permute.xlu0 %416 }
  0xf0   : > { %v4206_v59 = vpop.f32.mrb[0].mxu0  ;;  %v4211_v60 = vpop.f32.mrb[0].mxu1 }
  0xf1   : > { %v488_v61 = vadd.f32 %v4206_v59, %v4696_v52  ;;  %v699_v62 = vadd.f32 %v4211_v60, %v4696_v52  ;;  %v405_v63 = vpop.f32.mrb[1].mxu0  ;;  %v623_v0 = vpop.f32.mrb[1].mxu1 }
  0xf2   : > { %v419_v1 = vadd.f32 %v4696_v52, %v405_v63  ;;  %v4725_v2 = vadd.f32 %v623_v0, %v4696_v52 }
  0xf3   : > { %v490_v3 = vcombine.high %v488_v61, %v488_v61  ;;  %v497_v4 = vrot.slane %v488_v61, %v4707_v56  ;;  %v701_v5 = vcombine.high %v699_v62, %v699_v62  ;;  %v708_v6 = vrot.slane %v699_v62, %v4707_v56 }
  0xf4   : > { %v421_v7 = vcombine.high %v419_v1, %v419_v1  ;;  %v428_v8 = vrot.slane %v419_v1, %v4707_v56  ;;  %v634_v9 = vcombine.high %v4725_v2, %v4725_v2  ;;  %v4734_v10 = vrot.slane %v4725_v2, %v4707_v56  ;;  %v4736_v11 = vpop.f32.mrb[2].mxu0  ;;  %v4738_v12 = vpop.f32.mrb[2].mxu1 }
  0xf5   : > { %v504_v13 = vrot.slane %v490_v3, %v4707_v56  ;;  %v505_v14 = vcombine.high %v497_v4, %v497_v4  ;;  %v513_v15 = vrot.slane %v497_v4, %v4707_v56  ;;  %v715_v16 = vrot.slane %v701_v5, %v4707_v56  ;;  %v4743_v17 = vpop.f32.mrb[3].mxu0  ;;  %v4745_v18 = vpop.f32.mrb[3].mxu1 }
  0xf6   : > { %v716_v19 = vcombine.high %v708_v6, %v708_v6  ;;  %v724_v20 = vrot.slane %v708_v6, %v4707_v56  ;;  %v435_v21 = vrot.slane %v421_v7, %v4707_v56  ;;  %v436_v22 = vcombine.high %v428_v8, %v428_v8 }
  0xf7   : > { %v506_v23 = vcombine.high %v504_v13, %v504_v13  ;;  %v520_v24 = vrot.slane %v504_v13, %v4707_v56  ;;  %v527_v25 = vrot.slane %v505_v14, %v4707_v56  ;;  %v535_v26 = vcombine.high %v513_v15, %v513_v15  ;;  %3853 = vst.msk [vmem:[%s4625_s30 + $0x101] sm:$0x1] %vm479_vm2, %v513_v15 }
  0xf8   : > { %v717_v27 = vcombine.high %v715_v16, %v715_v16  ;;  %v731_v28 = vrot.slane %v715_v16, %v4707_v56  ;;  %v738_v29 = vrot.slane %v716_v19, %v4707_v56  ;;  %v746_v30 = vcombine.high %v724_v20, %v724_v20  ;;  %3872 = vst.msk [vmem:[%s4625_s30 + $0x103] sm:$0x1] %vm479_vm2, %v724_v20  ;;  %v4757_v31 = vpop.f32.mrb[4].mxu0  ;;  %v4759_v32 = vpop.f32.mrb[4].mxu1 }
  0xf9   : > { %v534_v33 = vrot.slane %v506_v23, %v4707_v56  ;;  %v536_v34 = vcombine.high %v520_v24, %v520_v24  ;;  %v537_v35 = vcombine.high %v527_v25, %v527_v25  ;;  %3854 = vst.msk [vmem:[%s4625_s30 + $0x121] sm:$0x1] %vm479_vm2, %v527_v25  ;;  %3855 = vst.msk [vmem:[%s4625_s30 + $0x141] sm:$0x1] %vm479_vm2, %v535_v26  ;;  %v4768_v37 = vpop.f32.mrb[5].mxu0  ;;  %v4770_v38 = vpop.f32.mrb[5].mxu1 }
  0xfa   : > { %3857 = vst.msk [vmem:[%s4625_s30 + $0x181] sm:$0x1] %vm479_vm2, %v520_v24  ;;  %v437_v36 = vcombine.high %v435_v21, %v435_v21  ;;  %v745_v39 = vrot.slane %v717_v27, %v4707_v56  ;;  %v747_v40 = vcombine.high %v731_v28, %v731_v28  ;;  %v748_v41 = vcombine.high %v738_v29, %v738_v29 }
  0xfb   : > { %3873 = vst.msk [vmem:[%s4625_s30 + $0x123] sm:$0x1] %vm479_vm2, %v738_v29  ;;  %3874 = vst.msk [vmem:[%s4625_s30 + $0x143] sm:$0x1] %vm479_vm2, %v746_v30  ;;  %v444_v42 = vrot.slane %v428_v8, %v4707_v56  ;;  %v538_v43 = vcombine.high %v534_v33, %v534_v33  ;;  %v451_v44 = vrot.slane %v435_v21, %v4707_v56 }
  0xfc   : > { %3876 = vst.msk [vmem:[%s4625_s30 + $0x183] sm:$0x1] %vm479_vm2, %v731_v28  ;;  %3856 = vst.msk [vmem:[%s4625_s30 + $0x161] sm:$0x1] %vm479_vm2, %v537_v35  ;;  %v458_v45 = vrot.slane %v436_v22, %v4707_v56  ;;  %v465_v46 = vrot.slane %v437_v36, %v4707_v56  ;;  %v749_v47 = vcombine.high %v745_v39, %v745_v39  ;;  %v4800_v51 = vpop.f32.mrb[6].mxu0  ;;  %v4802_v53 = vpop.f32.mrb[6].mxu1 }
  0xfd   : > { %3858 = vst.msk [vmem:[%s4625_s30 + $0x1a1] sm:$0x1] %vm479_vm2, %v534_v33  ;;  %3859 = vst.msk [vmem:[%s4625_s30 + $0x1c1] sm:$0x1] %vm479_vm2, %v536_v34  ;;  %v466_v48 = vcombine.high %v444_v42, %v444_v42  ;;  %v648_v49 = vrot.slane %v634_v9, %v4707_v56  ;;  %v649_v50 = vcombine.high %v4734_v10, %v4734_v10  ;;  %v4814_v59 = vpop.f32.mrb[7].mxu0  ;;  %v4816_v60 = vpop.f32.mrb[7].mxu1 }
  0xfe   : > { %3875 = vst.msk [vmem:[%s4625_s30 + $0x163] sm:$0x1] %vm479_vm2, %v748_v41  ;;  %3877 = vst.msk [vmem:[%s4625_s30 + $0x1a3] sm:$0x1] %vm479_vm2, %v745_v39  ;;  %v467_v54 = vcombine.high %v451_v44, %v451_v44  ;;  %v468_v55 = vcombine.high %v458_v45, %v458_v45  ;;  %v469_v57 = vcombine.high %v465_v46, %v465_v46 }
  0xff   : > { %3878 = vst.msk [vmem:[%s4625_s30 + $0x1c3] sm:$0x1] %vm479_vm2, %v747_v40  ;;  %3845 = vst.msk [vmem:[%s4625_s30 + $0x100] sm:$0x1] %vm479_vm2, %v444_v42  ;;  %v657_v58 = vrot.slane %v4734_v10, %v4707_v56  ;;  %v650_v61 = vcombine.high %v648_v49, %v648_v49  ;;  %v664_v62 = vrot.slane %v648_v49, %v4707_v56 }
 0x100   : > { %3860 = vst.msk [vmem:[%s4625_s30 + $0x1e1] sm:$0x1] %vm479_vm2, %v538_v43  ;;  %3846 = vst.msk [vmem:[%s4625_s30 + $0x120] sm:$0x1] %vm479_vm2, %v458_v45  ;;  %v671_v63 = vrot.slane %v649_v50, %v4707_v56  ;;  %v910_v0 = vadd.f32 %v4736_v11, %v4696_v52  ;;  %v1121_v2 = vadd.f32 %v4738_v12, %v4696_v52  ;;  %v4847_v9 = vpop.f32.mrb[8].mxu0  ;;  %v4849_v10 = vpop.f32.mrb[8].mxu1 }
 0x101   : > { %3849 = vst.msk [vmem:[%s4625_s30 + $0x180] sm:$0x1] %vm479_vm2, %v451_v44  ;;  %3850 = vst.msk [vmem:[%s4625_s30 + $0x1a0] sm:$0x1] %vm479_vm2, %v465_v46  ;;  %v679_v1 = vcombine.high %v657_v58, %v657_v58  ;;  %v843_v3 = vadd.f32 %v4743_v17, %v4696_v52  ;;  %v4840_v4 = vadd.f32 %v4745_v18, %v4696_v52  ;;  %v4855_v15 = vpop.f32.mrb[9].mxu0  ;;  %v4857_v16 = vpop.f32.mrb[9].mxu1 }
 0x102   : > { %3879 = vst.msk [vmem:[%s4625_s30 + $0x1e3] sm:$0x1] %vm479_vm2, %v749_v47  ;;  %3847 = vst.msk [vmem:[%s4625_s30 + $0x140] sm:$0x1] %vm479_vm2, %v466_v48  ;;  %v678_v5 = vrot.slane %v650_v61, %v4707_v56  ;;  %v680_v6 = vcombine.high %v664_v62, %v664_v62  ;;  %v681_v7 = vcombine.high %v671_v63, %v671_v63 }
 0x103   : > { %3848 = vst.msk [vmem:[%s4625_s30 + $0x160] sm:$0x1] %vm479_vm2, %v468_v55  ;;  %3851 = vst.msk [vmem:[%s4625_s30 + $0x1c0] sm:$0x1] %vm479_vm2, %v467_v54  ;;  %v912_v8 = vcombine.high %v910_v0, %v910_v0  ;;  %v919_v11 = vrot.slane %v910_v0, %v4707_v56  ;;  %v1123_v12 = vcombine.high %v1121_v2, %v1121_v2 }
 0x104   : > { %3852 = vst.msk [vmem:[%s4625_s30 + $0x1e0] sm:$0x1] %vm479_vm2, %v469_v57  ;;  %3864 = vst.msk [vmem:[%s4625_s30 + $0x102] sm:$0x1] %vm479_vm2, %v657_v58  ;;  %v1130_v13 = vrot.slane %v1121_v2, %v4707_v56  ;;  %v845_v14 = vcombine.high %v843_v3, %v843_v3  ;;  %v682_v17 = vcombine.high %v678_v5, %v678_v5  ;;  %v4876_v29 = vpop.f32.mrb[10].mxu0  ;;  %v4878_v30 = vpop.f32.mrb[10].mxu1 }
 0x105   : > { %3865 = vst.msk [vmem:[%s4625_s30 + $0x122] sm:$0x1] %vm479_vm2, %v671_v63  ;;  %3868 = vst.msk [vmem:[%s4625_s30 + $0x182] sm:$0x1] %vm479_vm2, %v664_v62  ;;  %v926_v18 = vrot.slane %v912_v8, %v4707_v56  ;;  %v852_v19 = vrot.slane %v843_v3, %v4707_v56  ;;  %v1056_v20 = vcombine.high %v4840_v4, %v4840_v4  ;;  %v4884_v39 = vpop.f32.mrb[11].mxu0  ;;  %v4886_v40 = vpop.f32.mrb[11].mxu1 }
 0x106   : > { %3866 = vst.msk [vmem:[%s4625_s30 + $0x142] sm:$0x1] %vm479_vm2, %v679_v1  ;;  %3867 = vst.msk [vmem:[%s4625_s30 + $0x162] sm:$0x1] %vm479_vm2, %v681_v7  ;;  %v927_v21 = vcombine.high %v919_v11, %v919_v11  ;;  %v935_v22 = vrot.slane %v919_v11, %v4707_v56  ;;  %v1137_v23 = vrot.slane %v1123_v12, %v4707_v56 }
 0x107   : > { %3869 = vst.msk [vmem:[%s4625_s30 + $0x1a2] sm:$0x1] %vm479_vm2, %v678_v5  ;;  %3870 = vst.msk [vmem:[%s4625_s30 + $0x1c2] sm:$0x1] %vm479_vm2, %v680_v6  ;;  %v1138_v24 = vcombine.high %v1130_v13, %v1130_v13  ;;  %v928_v25 = vcombine.high %v926_v18, %v926_v18  ;;  %v942_v26 = vrot.slane %v926_v18, %v4707_v56 }
 0x108   : > { %3871 = vst.msk [vmem:[%s4625_s30 + $0x1e2] sm:$0x1] %vm479_vm2, %v682_v17  ;;  %v1146_v27 = vrot.slane %v1130_v13, %v4707_v56  ;;  %v859_v28 = vrot.slane %v845_v14, %v4707_v56  ;;  %v949_v33 = vrot.slane %v927_v21, %v4707_v56  ;;  %v957_v34 = vcombine.high %v935_v22, %v935_v22  ;;  %v4910_v57 = vpop.f32.mrb[12].mxu0  ;;  %v4912_v58 = vpop.f32.mrb[12].mxu1 }
 0x109   : > { %3891 = vst.msk [vmem:[%s4625_s30 + $0x105] sm:$0x1] %vm479_vm2, %v935_v22  ;;  %v1139_v35 = vcombine.high %v1137_v23, %v1137_v23  ;;  %v1153_v36 = vrot.slane %v1137_v23, %v4707_v56  ;;  %v956_v41 = vrot.slane %v928_v25, %v4707_v56  ;;  %v958_v42 = vcombine.high %v942_v26, %v942_v26  ;;  %v4924_v1 = vpop.f32.mrb[13].mxu0  ;;  %v4926_v2 = vpop.f32.mrb[13].mxu1 }
 0x10a   : > { %3895 = vst.msk [vmem:[%s4625_s30 + $0x185] sm:$0x1] %vm479_vm2, %v942_v26  ;;  %v1160_v43 = vrot.slane %v1138_v24, %v4707_v56  ;;  %v1168_v44 = vcombine.high %v1146_v27, %v1146_v27  ;;  %3910 = vst.msk [vmem:[%s4625_s30 + $0x107] sm:$0x1] %vm479_vm2, %v1146_v27  ;;  %v959_v45 = vcombine.high %v949_v33, %v949_v33 }
 0x10b   : > { %3892 = vst.msk [vmem:[%s4625_s30 + $0x125] sm:$0x1] %vm479_vm2, %v949_v33  ;;  %3893 = vst.msk [vmem:[%s4625_s30 + $0x145] sm:$0x1] %vm479_vm2, %v957_v34  ;;  %v1167_v46 = vrot.slane %v1139_v35, %v4707_v56  ;;  %v1169_v47 = vcombine.high %v1153_v36, %v1153_v36  ;;  %v860_v48 = vcombine.high %v852_v19, %v852_v19 }
 0x10c   : > { %3914 = vst.msk [vmem:[%s4625_s30 + $0x187] sm:$0x1] %vm479_vm2, %v1153_v36  ;;  %v960_v49 = vcombine.high %v956_v41, %v956_v41  ;;  %3896 = vst.msk [vmem:[%s4625_s30 + $0x1a5] sm:$0x1] %vm479_vm2, %v956_v41  ;;  %v1170_v50 = vcombine.high %v1160_v43, %v1160_v43  ;;  %v861_v54 = vcombine.high %v859_v28, %v859_v28  ;;  %v4950_v18 = vpop.f32.mrb[14].mxu0 }
 0x10d   : > { %3897 = vst.msk [vmem:[%s4625_s30 + $0x1c5] sm:$0x1] %vm479_vm2, %v958_v42  ;;  %3911 = vst.msk [vmem:[%s4625_s30 + $0x127] sm:$0x1] %vm479_vm2, %v1160_v43  ;;  %v868_v55 = vrot.slane %v852_v19, %v4707_v56  ;;  %v1171_v61 = vcombine.high %v1167_v46, %v1167_v46  ;;  %v875_v62 = vrot.slane %v859_v28, %v4707_v56  ;;  %v4952_v19 = vpop.f32.mrb[14].mxu1  ;;  %v4964_v24 = vpop.f32.mrb[15].mxu0 }
 0x10e   : > { %3912 = vst.msk [vmem:[%s4625_s30 + $0x147] sm:$0x1] %vm479_vm2, %v1168_v44  ;;  %3894 = vst.msk [vmem:[%s4625_s30 + $0x165] sm:$0x1] %vm479_vm2, %v959_v45  ;;  %v882_v63 = vrot.slane %v860_v48, %v4707_v56  ;;  %v1063_v0 = vrot.slane %v4840_v4, %v4707_v56  ;;  %v889_v3 = vrot.slane %v861_v54, %v4707_v56  ;;  %v4966_v25 = vpop.f32.mrb[15].mxu1 }
 0x10f   : > { %3915 = vst.msk [vmem:[%s4625_s30 + $0x1a7] sm:$0x1] %vm479_vm2, %v1167_v46  ;;  %3916 = vst.msk [vmem:[%s4625_s30 + $0x1c7] sm:$0x1] %vm479_vm2, %v1169_v47  ;;  %v890_v5 = vcombine.high %v868_v55, %v868_v55  ;;  %v1070_v6 = vrot.slane %v1056_v20, %v4707_v56  ;;  %v1332_v4 = vadd.f32 %v4757_v31, %v4696_v52 }
 0x110   : > { %3898 = vst.msk [vmem:[%s4625_s30 + $0x1e5] sm:$0x1] %vm479_vm2, %v960_v49  ;;  %3913 = vst.msk [vmem:[%s4625_s30 + $0x167] sm:$0x1] %vm479_vm2, %v1170_v50  ;;  %v891_v7 = vcombine.high %v875_v62, %v875_v62  ;;  %v892_v8 = vcombine.high %v882_v63, %v882_v63  ;;  %v1071_v11 = vcombine.high %v1063_v0, %v1063_v0 }
 0x111   : > { %3883 = vst.msk [vmem:[%s4625_s30 + $0x104] sm:$0x1] %vm479_vm2, %v868_v55  ;;  %3917 = vst.msk [vmem:[%s4625_s30 + $0x1e7] sm:$0x1] %vm479_vm2, %v1171_v61  ;;  %v1079_v12 = vrot.slane %v1063_v0, %v4707_v56  ;;  %v893_v13 = vcombine.high %v889_v3, %v889_v3  ;;  %v1072_v31 = vcombine.high %v1070_v6, %v1070_v6 }
 0x112   : > { %3884 = vst.msk [vmem:[%s4625_s30 + $0x124] sm:$0x1] %vm479_vm2, %v882_v63  ;;  %3887 = vst.msk [vmem:[%s4625_s30 + $0x184] sm:$0x1] %vm479_vm2, %v875_v62  ;;  %v1086_v14 = vrot.slane %v1070_v6, %v4707_v56  ;;  %v1334_v17 = vcombine.high %v1332_v4, %v1332_v4  ;;  %v1093_v20 = vrot.slane %v1071_v11, %v4707_v56 }
 0x113   : > { %3885 = vst.msk [vmem:[%s4625_s30 + $0x144] sm:$0x1] %vm479_vm2, %v890_v5  ;;  %3888 = vst.msk [vmem:[%s4625_s30 + $0x1a4] sm:$0x1] %vm479_vm2, %v889_v3  ;;  %v1101_v21 = vcombine.high %v1079_v12, %v1079_v12  ;;  %v1341_v22 = vrot.slane %v1332_v4, %v4707_v56  ;;  %v1543_v23 = vadd.f32 %v4759_v32, %v4696_v52 }
 0x114   : > { %3886 = vst.msk [vmem:[%s4625_s30 + $0x164] sm:$0x1] %vm479_vm2, %v892_v8  ;;  %3889 = vst.msk [vmem:[%s4625_s30 + $0x1c4] sm:$0x1] %vm479_vm2, %v891_v7  ;;  %v1100_v26 = vrot.slane %v1072_v31, %v4707_v56  ;;  %v1102_v27 = vcombine.high %v1086_v14, %v1086_v14  ;;  %v1348_v28 = vrot.slane %v1334_v17, %v4707_v56 }
 0x115   : > { %3902 = vst.msk [vmem:[%s4625_s30 + $0x106] sm:$0x1] %vm479_vm2, %v1079_v12  ;;  %3890 = vst.msk [vmem:[%s4625_s30 + $0x1e4] sm:$0x1] %vm479_vm2, %v893_v13  ;;  %v1265_v33 = vadd.f32 %v4768_v37, %v4696_v52  ;;  %v1103_v32 = vcombine.high %v1093_v20, %v1093_v20  ;;  %v1349_v34 = vcombine.high %v1341_v22, %v1341_v22 }
 0x116   : > { %3906 = vst.msk [vmem:[%s4625_s30 + $0x186] sm:$0x1] %vm479_vm2, %v1086_v14  ;;  %3903 = vst.msk [vmem:[%s4625_s30 + $0x126] sm:$0x1] %vm479_vm2, %v1093_v20  ;;  %v1357_v35 = vrot.slane %v1341_v22, %v4707_v56  ;;  %v1545_v36 = vcombine.high %v1543_v23, %v1543_v23  ;;  %v1104_v41 = vcombine.high %v1100_v26, %v1100_v26 }
 0x117   : > { %3904 = vst.msk [vmem:[%s4625_s30 + $0x146] sm:$0x1] %vm479_vm2, %v1101_v21  ;;  %3907 = vst.msk [vmem:[%s4625_s30 + $0x1a6] sm:$0x1] %vm479_vm2, %v1100_v26  ;;  %v1350_v42 = vcombine.high %v1348_v28, %v1348_v28  ;;  %v1364_v37 = vrot.slane %v1348_v28, %v4707_v56  ;;  %v1552_v43 = vrot.slane %v1543_v23, %v4707_v56 }
 0x118   : > { %3908 = vst.msk [vmem:[%s4625_s30 + $0x1c6] sm:$0x1] %vm479_vm2, %v1102_v27  ;;  %3905 = vst.msk [vmem:[%s4625_s30 + $0x166] sm:$0x1] %vm479_vm2, %v1103_v32  ;;  %v1371_v44 = vrot.slane %v1349_v34, %v4707_v56  ;;  %v1379_v45 = vcombine.high %v1357_v35, %v1357_v35  ;;  %v1559_v46 = vrot.slane %v1545_v36, %v4707_v56 }
 0x119   : > { %3929 = vst.msk [vmem:[%s4625_s30 + $0x109] sm:$0x1] %vm479_vm2, %v1357_v35  ;;  %v1267_v47 = vcombine.high %v1265_v33, %v1265_v33  ;;  %3909 = vst.msk [vmem:[%s4625_s30 + $0x1e6] sm:$0x1] %vm479_vm2, %v1104_v41  ;;  %v1378_v48 = vrot.slane %v1350_v42, %v4707_v56  ;;  %v1380_v49 = vcombine.high %v1364_v37, %v1364_v37 }
 0x11a   : > { %3933 = vst.msk [vmem:[%s4625_s30 + $0x189] sm:$0x1] %vm479_vm2, %v1364_v37  ;;  %v1560_v50 = vcombine.high %v1552_v43, %v1552_v43  ;;  %v1568_v54 = vrot.slane %v1552_v43, %v4707_v56  ;;  %v1381_v55 = vcombine.high %v1371_v44, %v1371_v44  ;;  %3930 = vst.msk [vmem:[%s4625_s30 + $0x129] sm:$0x1] %vm479_vm2, %v1371_v44 }
 0x11b   : > { %3931 = vst.msk [vmem:[%s4625_s30 + $0x149] sm:$0x1] %vm479_vm2, %v1379_v45  ;;  %v1561_v61 = vcombine.high %v1559_v46, %v1559_v46  ;;  %v1575_v62 = vrot.slane %v1559_v46, %v4707_v56  ;;  %v1274_v63 = vrot.slane %v1265_v33, %v4707_v56  ;;  %v1382_v0 = vcombine.high %v1378_v48, %v1378_v48 }
 0x11c   : > { %3934 = vst.msk [vmem:[%s4625_s30 + $0x1a9] sm:$0x1] %vm479_vm2, %v1378_v48  ;;  %3935 = vst.msk [vmem:[%s4625_s30 + $0x1c9] sm:$0x1] %vm479_vm2, %v1380_v49  ;;  %v1582_v3 = vrot.slane %v1560_v50, %v4707_v56  ;;  %v1590_v5 = vcombine.high %v1568_v54, %v1568_v54  ;;  %v1281_v6 = vrot.slane %v1267_v47, %v4707_v56 }
 0x11d   : > { %3948 = vst.msk [vmem:[%s4625_s30 + $0x10b] sm:$0x1] %vm479_vm2, %v1568_v54  ;;  %3932 = vst.msk [vmem:[%s4625_s30 + $0x169] sm:$0x1] %vm479_vm2, %v1381_v55  ;;  %v1589_v4 = vrot.slane %v1561_v61, %v4707_v56  ;;  %v1591_v7 = vcombine.high %v1575_v62, %v1575_v62  ;;  %v1282_v8 = vcombine.high %v1274_v63, %v1274_v63 }
 0x11e   : > { %3952 = vst.msk [vmem:[%s4625_s30 + $0x18b] sm:$0x1] %vm479_vm2, %v1575_v62  ;;  %v1290_v11 = vrot.slane %v1274_v63, %v4707_v56  ;;  %3936 = vst.msk [vmem:[%s4625_s30 + $0x1e9] sm:$0x1] %vm479_vm2, %v1382_v0  ;;  %v1592_v12 = vcombine.high %v1582_v3, %v1582_v3  ;;  %v1283_v13 = vcombine.high %v1281_v6, %v1281_v6 }
 0x11f   : > { %3949 = vst.msk [vmem:[%s4625_s30 + $0x12b] sm:$0x1] %vm479_vm2, %v1582_v3  ;;  %3950 = vst.msk [vmem:[%s4625_s30 + $0x14b] sm:$0x1] %vm479_vm2, %v1590_v5  ;;  %v1297_v31 = vrot.slane %v1281_v6, %v4707_v56  ;;  %v1476_v14 = vadd.f32 %v4770_v38, %v4696_v52  ;;  %v1593_v17 = vcombine.high %v1589_v4, %v1589_v4 }
 0x120   : > { %3953 = vst.msk [vmem:[%s4625_s30 + $0x1ab] sm:$0x1] %vm479_vm2, %v1589_v4  ;;  %3954 = vst.msk [vmem:[%s4625_s30 + $0x1cb] sm:$0x1] %vm479_vm2, %v1591_v7  ;;  %v1304_v20 = vrot.slane %v1282_v8, %v4707_v56  ;;  %v1312_v21 = vcombine.high %v1290_v11, %v1290_v11  ;;  %v1754_v22 = vadd.f32 %v4800_v51, %v4696_v52 }
 0x121   : > { %3921 = vst.msk [vmem:[%s4625_s30 + $0x108] sm:$0x1] %vm479_vm2, %v1290_v11  ;;  %3951 = vst.msk [vmem:[%s4625_s30 + $0x16b] sm:$0x1] %vm479_vm2, %v1592_v12  ;;  %v1311_v38 = vrot.slane %v1283_v13, %v4707_v56  ;;  %v1313_v23 = vcombine.high %v1297_v31, %v1297_v31  ;;  %v1478_v26 = vcombine.high %v1476_v14, %v1476_v14 }
 0x122   : > { %3925 = vst.msk [vmem:[%s4625_s30 + $0x188] sm:$0x1] %vm479_vm2, %v1297_v31  ;;  %v1485_v27 = vrot.slane %v1476_v14, %v4707_v56  ;;  %3955 = vst.msk [vmem:[%s4625_s30 + $0x1eb] sm:$0x1] %vm479_vm2, %v1593_v17  ;;  %v1314_v28 = vcombine.high %v1304_v20, %v1304_v20  ;;  %v1756_v51 = vcombine.high %v1754_v22, %v1754_v22 }
 0x123   : > { %3922 = vst.msk [vmem:[%s4625_s30 + $0x128] sm:$0x1] %vm479_vm2, %v1304_v20  ;;  %3923 = vst.msk [vmem:[%s4625_s30 + $0x148] sm:$0x1] %vm479_vm2, %v1312_v21  ;;  %v1763_v33 = vrot.slane %v1754_v22, %v4707_v56  ;;  %v1965_v32 = vadd.f32 %v4802_v53, %v4696_v52  ;;  %v1315_v34 = vcombine.high %v1311_v38, %v1311_v38 }
 0x124   : > { %3926 = vst.msk [vmem:[%s4625_s30 + $0x1a8] sm:$0x1] %vm479_vm2, %v1311_v38  ;;  %3927 = vst.msk [vmem:[%s4625_s30 + $0x1c8] sm:$0x1] %vm479_vm2, %v1313_v23  ;;  %v1492_v35 = vrot.slane %v1478_v26, %v4707_v56  ;;  %v1493_v36 = vcombine.high %v1485_v27, %v1485_v27  ;;  %v1501_v41 = vrot.slane %v1485_v27, %v4707_v56 }
 0x125   : > { %3924 = vst.msk [vmem:[%s4625_s30 + $0x168] sm:$0x1] %vm479_vm2, %v1314_v28  ;;  %v1770_v42 = vrot.slane %v1756_v51, %v4707_v56  ;;  %v1771_v37 = vcombine.high %v1763_v33, %v1763_v33  ;;  %v1779_v43 = vrot.slane %v1763_v33, %v4707_v56  ;;  %v1967_v53 = vcombine.high %v1965_v32, %v1965_v32 }
 0x126   : > { %3928 = vst.msk [vmem:[%s4625_s30 + $0x1e8] sm:$0x1] %vm479_vm2, %v1315_v34  ;;  %v1494_v44 = vcombine.high %v1492_v35, %v1492_v35  ;;  %v1508_v45 = vrot.slane %v1492_v35, %v4707_v56  ;;  %v1515_v46 = vrot.slane %v1493_v36, %v4707_v56  ;;  %v1523_v47 = vcombine.high %v1501_v41, %v1501_v41 }
 0x127   : > { %3940 = vst.msk [vmem:[%s4625_s30 + $0x10a] sm:$0x1] %vm479_vm2, %v1501_v41  ;;  %v1772_v48 = vcombine.high %v1770_v42, %v1770_v42  ;;  %v1786_v49 = vrot.slane %v1770_v42, %v4707_v56  ;;  %v1793_v50 = vrot.slane %v1771_v37, %v4707_v56  ;;  %v1801_v54 = vcombine.high %v1779_v43, %v1779_v43 }
 0x128   : > { %3967 = vst.msk [vmem:[%s4625_s30 + $0x10d] sm:$0x1] %vm479_vm2, %v1779_v43  ;;  %v1522_v55 = vrot.slane %v1494_v44, %v4707_v56  ;;  %v1524_v61 = vcombine.high %v1508_v45, %v1508_v45  ;;  %v1525_v62 = vcombine.high %v1515_v46, %v1515_v46  ;;  %3941 = vst.msk [vmem:[%s4625_s30 + $0x12a] sm:$0x1] %vm479_vm2, %v1515_v46 }
 0x129   : > { %3942 = vst.msk [vmem:[%s4625_s30 + $0x14a] sm:$0x1] %vm479_vm2, %v1523_v47  ;;  %3944 = vst.msk [vmem:[%s4625_s30 + $0x18a] sm:$0x1] %vm479_vm2, %v1508_v45  ;;  %v1974_v63 = vrot.slane %v1965_v32, %v4707_v56  ;;  %v1800_v0 = vrot.slane %v1772_v48, %v4707_v56  ;;  %v1802_v3 = vcombine.high %v1786_v49, %v1786_v49 }
 0x12a   : > { %v1803_v5 = vcombine.high %v1793_v50, %v1793_v50  ;;  %3968 = vst.msk [vmem:[%s4625_s30 + $0x12d] sm:$0x1] %vm479_vm2, %v1793_v50  ;;  %3969 = vst.msk [vmem:[%s4625_s30 + $0x14d] sm:$0x1] %vm479_vm2, %v1801_v54  ;;  %v1981_v6 = vrot.slane %v1967_v53, %v4707_v56  ;;  %v1526_v4 = vcombine.high %v1522_v55, %v1522_v55 }
 0x12b   : > { %3971 = vst.msk [vmem:[%s4625_s30 + $0x18d] sm:$0x1] %vm479_vm2, %v1786_v49  ;;  %3943 = vst.msk [vmem:[%s4625_s30 + $0x16a] sm:$0x1] %vm479_vm2, %v1525_v62  ;;  %v1982_v7 = vcombine.high %v1974_v63, %v1974_v63  ;;  %v1990_v8 = vrot.slane %v1974_v63, %v4707_v56  ;;  %v1687_v11 = vadd.f32 %v4814_v59, %v4696_v52 }
 0x12c   : > { %3945 = vst.msk [vmem:[%s4625_s30 + $0x1aa] sm:$0x1] %vm479_vm2, %v1522_v55  ;;  %3946 = vst.msk [vmem:[%s4625_s30 + $0x1ca] sm:$0x1] %vm479_vm2, %v1524_v61  ;;  %v1804_v12 = vcombine.high %v1800_v0, %v1800_v0  ;;  %v1983_v13 = vcombine.high %v1981_v6, %v1981_v6  ;;  %v1997_v31 = vrot.slane %v1981_v6, %v4707_v56 }
 0x12d   : > { %3970 = vst.msk [vmem:[%s4625_s30 + $0x16d] sm:$0x1] %vm479_vm2, %v1803_v5  ;;  %3972 = vst.msk [vmem:[%s4625_s30 + $0x1ad] sm:$0x1] %vm479_vm2, %v1800_v0  ;;  %v1898_v14 = vadd.f32 %v4816_v60, %v4696_v52  ;;  %v2004_v59 = vrot.slane %v1982_v7, %v4707_v56  ;;  %v2012_v17 = vcombine.high %v1990_v8, %v1990_v8 }
 0x12e   : > { %3973 = vst.msk [vmem:[%s4625_s30 + $0x1cd] sm:$0x1] %vm479_vm2, %v1802_v3  ;;  %3947 = vst.msk [vmem:[%s4625_s30 + $0x1ea] sm:$0x1] %vm479_vm2, %v1526_v4  ;;  %v1689_v20 = vcombine.high %v1687_v11, %v1687_v11  ;;  %v1696_v21 = vrot.slane %v1687_v11, %v4707_v56  ;;  %v2011_v22 = vrot.slane %v1983_v13, %v4707_v56 }
 0x12f   : > { %3986 = vst.msk [vmem:[%s4625_s30 + $0x10f] sm:$0x1] %vm479_vm2, %v1990_v8  ;;  %3974 = vst.msk [vmem:[%s4625_s30 + $0x1ed] sm:$0x1] %vm479_vm2, %v1804_v12  ;;  %v2013_v38 = vcombine.high %v1997_v31, %v1997_v31  ;;  %v1900_v60 = vcombine.high %v1898_v14, %v1898_v14  ;;  %v1907_v23 = vrot.slane %v1898_v14, %v4707_v56 }
 0x130   : > { %3990 = vst.msk [vmem:[%s4625_s30 + $0x18f] sm:$0x1] %vm479_vm2, %v1997_v31  ;;  %v2014_v26 = vcombine.high %v2004_v59, %v2004_v59  ;;  %3987 = vst.msk [vmem:[%s4625_s30 + $0x12f] sm:$0x1] %vm479_vm2, %v2004_v59  ;;  %v1703_v27 = vrot.slane %v1689_v20, %v4707_v56  ;;  %v1704_v28 = vcombine.high %v1696_v21, %v1696_v21 }
 0x131   : > { %3988 = vst.msk [vmem:[%s4625_s30 + $0x14f] sm:$0x1] %vm479_vm2, %v2012_v17  ;;  %v1712_v51 = vrot.slane %v1696_v21, %v4707_v56  ;;  %v2015_v33 = vcombine.high %v2011_v22, %v2011_v22  ;;  %3991 = vst.msk [vmem:[%s4625_s30 + $0x1af] sm:$0x1] %vm479_vm2, %v2011_v22  ;;  %v1914_v32 = vrot.slane %v1900_v60, %v4707_v56 }
 0x132   : > { %3992 = vst.msk [vmem:[%s4625_s30 + $0x1cf] sm:$0x1] %vm479_vm2, %v2013_v38  ;;  %v1915_v34 = vcombine.high %v1907_v23, %v1907_v23  ;;  %v1923_v35 = vrot.slane %v1907_v23, %v4707_v56  ;;  %3989 = vst.msk [vmem:[%s4625_s30 + $0x16f] sm:$0x1] %vm479_vm2, %v2014_v26  ;;  %v1705_v36 = vcombine.high %v1703_v27, %v1703_v27 }
 0x133   : > { %v1719_v41 = vrot.slane %v1703_v27, %v4707_v56  ;;  %v1726_v42 = vrot.slane %v1704_v28, %v4707_v56  ;;  %v1734_v37 = vcombine.high %v1712_v51, %v1712_v51  ;;  %3959 = vst.msk [vmem:[%s4625_s30 + $0x10c] sm:$0x1] %vm479_vm2, %v1712_v51  ;;  %3993 = vst.msk [vmem:[%s4625_s30 + $0x1ef] sm:$0x1] %vm479_vm2, %v2015_v33 }
 0x134   : > { %v1916_v43 = vcombine.high %v1914_v32, %v1914_v32  ;;  %v1930_v53 = vrot.slane %v1914_v32, %v4707_v56  ;;  %v1937_v44 = vrot.slane %v1915_v34, %v4707_v56  ;;  %v1945_v45 = vcombine.high %v1923_v35, %v1923_v35  ;;  %3978 = vst.msk [vmem:[%s4625_s30 + $0x10e] sm:$0x1] %vm479_vm2, %v1923_v35 }
 0x135   : > { %v1733_v46 = vrot.slane %v1705_v36, %v4707_v56  ;;  %v1735_v47 = vcombine.high %v1719_v41, %v1719_v41  ;;  %v1736_v48 = vcombine.high %v1726_v42, %v1726_v42  ;;  %3960 = vst.msk [vmem:[%s4625_s30 + $0x12c] sm:$0x1] %vm479_vm2, %v1726_v42  ;;  %3961 = vst.msk [vmem:[%s4625_s30 + $0x14c] sm:$0x1] %vm479_vm2, %v1734_v37 }
 0x136   : > { %3963 = vst.msk [vmem:[%s4625_s30 + $0x18c] sm:$0x1] %vm479_vm2, %v1719_v41  ;;  %v2176_v49 = vadd.f32 %v4847_v9, %v4696_v52  ;;  %v1944_v50 = vrot.slane %v1916_v43, %v4707_v56  ;;  %v1946_v54 = vcombine.high %v1930_v53, %v1930_v53  ;;  %v1947_v55 = vcombine.high %v1937_v44, %v1937_v44 }
 0x137   : > { %3979 = vst.msk [vmem:[%s4625_s30 + $0x12e] sm:$0x1] %vm479_vm2, %v1937_v44  ;;  %3980 = vst.msk [vmem:[%s4625_s30 + $0x14e] sm:$0x1] %vm479_vm2, %v1945_v45  ;;  %v2387_v61 = vadd.f32 %v4849_v10, %v4696_v52  ;;  %v1737_v62 = vcombine.high %v1733_v46, %v1733_v46  ;;  %v2109_v0 = vadd.f32 %v4855_v15, %v4696_v52 }
 0x138   : > { %3982 = vst.msk [vmem:[%s4625_s30 + $0x18e] sm:$0x1] %vm479_vm2, %v1930_v53  ;;  %3962 = vst.msk [vmem:[%s4625_s30 + $0x16c] sm:$0x1] %vm479_vm2, %v1736_v48  ;;  %v2178_v9 = vcombine.high %v2176_v49, %v2176_v49  ;;  %v2185_v63 = vrot.slane %v2176_v49, %v4707_v56  ;;  %v1948_v3 = vcombine.high %v1944_v50, %v1944_v50 }
 0x139   : > { %3964 = vst.msk [vmem:[%s4625_s30 + $0x1ac] sm:$0x1] %vm479_vm2, %v1733_v46  ;;  %3965 = vst.msk [vmem:[%s4625_s30 + $0x1cc] sm:$0x1] %vm479_vm2, %v1735_v47  ;;  %v2389_v10 = vcombine.high %v2387_v61, %v2387_v61  ;;  %v2396_v5 = vrot.slane %v2387_v61, %v4707_v56  ;;  %v2320_v6 = vadd.f32 %v4857_v16, %v4696_v52 }
 0x13a   : > { %3981 = vst.msk [vmem:[%s4625_s30 + $0x16e] sm:$0x1] %vm479_vm2, %v1947_v55  ;;  %3983 = vst.msk [vmem:[%s4625_s30 + $0x1ae] sm:$0x1] %vm479_vm2, %v1944_v50  ;;  %v2192_v4 = vrot.slane %v2178_v9, %v4707_v56  ;;  %v2193_v7 = vcombine.high %v2185_v63, %v2185_v63  ;;  %v2201_v15 = vrot.slane %v2185_v63, %v4707_v56 }
 0x13b   : > { %3984 = vst.msk [vmem:[%s4625_s30 + $0x1ce] sm:$0x1] %vm479_vm2, %v1946_v54  ;;  %3966 = vst.msk [vmem:[%s4625_s30 + $0x1ec] sm:$0x1] %vm479_vm2, %v1737_v62  ;;  %v2111_v8 = vcombine.high %v2109_v0, %v2109_v0  ;;  %v2403_v11 = vrot.slane %v2389_v10, %v4707_v56  ;;  %v2404_v12 = vcombine.high %v2396_v5, %v2396_v5 }
 0x13c   : > { %3985 = vst.msk [vmem:[%s4625_s30 + $0x1ee] sm:$0x1] %vm479_vm2, %v1948_v3  ;;  %v2412_v13 = vrot.slane %v2396_v5, %v4707_v56  ;;  %v2118_v16 = vrot.slane %v2109_v0, %v4707_v56  ;;  %v2194_v31 = vcombine.high %v2192_v4, %v2192_v4  ;;  %v2208_v14 = vrot.slane %v2192_v4, %v4707_v56 }
 0x13d   : > { %v2215_v59 = vrot.slane %v2193_v7, %v4707_v56  ;;  %v2223_v17 = vcombine.high %v2201_v15, %v2201_v15  ;;  %4005 = vst.msk [vmem:[%s4625_s30 + $0x111] sm:$0x1] %vm479_vm2, %v2201_v15  ;;  %v2405_v20 = vcombine.high %v2403_v11, %v2403_v11  ;;  %v2419_v21 = vrot.slane %v2403_v11, %v4707_v56 }
 0x13e   : > { %v2426_v22 = vrot.slane %v2404_v12, %v4707_v56  ;;  %v2434_v38 = vcombine.high %v2412_v13, %v2412_v13  ;;  %4024 = vst.msk [vmem:[%s4625_s30 + $0x113] sm:$0x1] %vm479_vm2, %v2412_v13  ;;  %v2222_v60 = vrot.slane %v2194_v31, %v4707_v56  ;;  %v2224_v23 = vcombine.high %v2208_v14, %v2208_v14 }
 0x13f   : > { %v2225_v26 = vcombine.high %v2215_v59, %v2215_v59  ;;  %4006 = vst.msk [vmem:[%s4625_s30 + $0x131] sm:$0x1] %vm479_vm2, %v2215_v59  ;;  %4007 = vst.msk [vmem:[%s4625_s30 + $0x151] sm:$0x1] %vm479_vm2, %v2223_v17  ;;  %v2125_v27 = vrot.slane %v2111_v8, %v4707_v56  ;;  %v2433_v28 = vrot.slane %v2405_v20, %v4707_v56 }
 0x140   : > { %4009 = vst.msk [vmem:[%s4625_s30 + $0x191] sm:$0x1] %vm479_vm2, %v2208_v14  ;;  %v2435_v51 = vcombine.high %v2419_v21, %v2419_v21  ;;  %v2436_v33 = vcombine.high %v2426_v22, %v2426_v22  ;;  %4025 = vst.msk [vmem:[%s4625_s30 + $0x133] sm:$0x1] %vm479_vm2, %v2426_v22  ;;  %v2126_v32 = vcombine.high %v2118_v16, %v2118_v16 }
 0x141   : > { %4026 = vst.msk [vmem:[%s4625_s30 + $0x153] sm:$0x1] %vm479_vm2, %v2434_v38  ;;  %4028 = vst.msk [vmem:[%s4625_s30 + $0x193] sm:$0x1] %vm479_vm2, %v2419_v21  ;;  %v2226_v34 = vcombine.high %v2222_v60, %v2222_v60  ;;  %v2127_v35 = vcombine.high %v2125_v27, %v2125_v27  ;;  %v2134_v36 = vrot.slane %v2118_v16, %v4707_v56 }
 0x142   : > { %4008 = vst.msk [vmem:[%s4625_s30 + $0x171] sm:$0x1] %vm479_vm2, %v2225_v26  ;;  %4010 = vst.msk [vmem:[%s4625_s30 + $0x1b1] sm:$0x1] %vm479_vm2, %v2222_v60  ;;  %v2141_v41 = vrot.slane %v2125_v27, %v4707_v56  ;;  %v2437_v42 = vcombine.high %v2433_v28, %v2433_v28  ;;  %v2148_v37 = vrot.slane %v2126_v32, %v4707_v56 }
 0x143   : > { %4011 = vst.msk [vmem:[%s4625_s30 + $0x1d1] sm:$0x1] %vm479_vm2, %v2224_v23  ;;  %4027 = vst.msk [vmem:[%s4625_s30 + $0x173] sm:$0x1] %vm479_vm2, %v2436_v33  ;;  %v2322_v43 = vcombine.high %v2320_v6, %v2320_v6  ;;  %v2329_v53 = vrot.slane %v2320_v6, %v4707_v56  ;;  %v2155_v44 = vrot.slane %v2127_v35, %v4707_v56 }
 0x144   : > { %4029 = vst.msk [vmem:[%s4625_s30 + $0x1b3] sm:$0x1] %vm479_vm2, %v2433_v28  ;;  %4030 = vst.msk [vmem:[%s4625_s30 + $0x1d3] sm:$0x1] %vm479_vm2, %v2435_v51  ;;  %v2156_v45 = vcombine.high %v2134_v36, %v2134_v36  ;;  %v2157_v46 = vcombine.high %v2141_v41, %v2141_v41  ;;  %v2598_v47 = vadd.f32 %v4876_v29, %v4696_v52 }
 0x145   : > { %4012 = vst.msk [vmem:[%s4625_s30 + $0x1f1] sm:$0x1] %vm479_vm2, %v2226_v34  ;;  %3997 = vst.msk [vmem:[%s4625_s30 + $0x110] sm:$0x1] %vm479_vm2, %v2134_v36  ;;  %v2158_v48 = vcombine.high %v2148_v37, %v2148_v37  ;;  %v2336_v49 = vrot.slane %v2322_v43, %v4707_v56  ;;  %v2337_v50 = vcombine.high %v2329_v53, %v2329_v53 }
 0x146   : > { %4001 = vst.msk [vmem:[%s4625_s30 + $0x190] sm:$0x1] %vm479_vm2, %v2141_v41  ;;  %4031 = vst.msk [vmem:[%s4625_s30 + $0x1f3] sm:$0x1] %vm479_vm2, %v2437_v42  ;;  %v2345_v54 = vrot.slane %v2329_v53, %v4707_v56  ;;  %v2159_v55 = vcombine.high %v2155_v44, %v2155_v44  ;;  %v2600_v29 = vcombine.high %v2598_v47, %v2598_v47 }
 0x147   : > { %3998 = vst.msk [vmem:[%s4625_s30 + $0x130] sm:$0x1] %vm479_vm2, %v2148_v37  ;;  %3999 = vst.msk [vmem:[%s4625_s30 + $0x150] sm:$0x1] %vm479_vm2, %v2156_v45  ;;  %v2607_v61 = vrot.slane %v2598_v47, %v4707_v56  ;;  %v2809_v62 = vadd.f32 %v4878_v30, %v4696_v52  ;;  %v2338_v9 = vcombine.high %v2336_v49, %v2336_v49 }
 0x148   : > { %4002 = vst.msk [vmem:[%s4625_s30 + $0x1b0] sm:$0x1] %vm479_vm2, %v2155_v44  ;;  %4003 = vst.msk [vmem:[%s4625_s30 + $0x1d0] sm:$0x1] %vm479_vm2, %v2157_v46  ;;  %v2352_v63 = vrot.slane %v2336_v49, %v4707_v56  ;;  %v2359_v0 = vrot.slane %v2337_v50, %v4707_v56  ;;  %v2367_v3 = vcombine.high %v2345_v54, %v2345_v54 }
 0x149   : > { %4000 = vst.msk [vmem:[%s4625_s30 + $0x170] sm:$0x1] %vm479_vm2, %v2158_v48  ;;  %4016 = vst.msk [vmem:[%s4625_s30 + $0x112] sm:$0x1] %vm479_vm2, %v2345_v54  ;;  %v2614_v10 = vrot.slane %v2600_v29, %v4707_v56  ;;  %v2615_v5 = vcombine.high %v2607_v61, %v2607_v61  ;;  %v2623_v30 = vrot.slane %v2607_v61, %v4707_v56 }
 0x14a   : > { %4004 = vst.msk [vmem:[%s4625_s30 + $0x1f0] sm:$0x1] %vm479_vm2, %v2159_v55  ;;  %v2811_v6 = vcombine.high %v2809_v62, %v2809_v62  ;;  %v2366_v4 = vrot.slane %v2338_v9, %v4707_v56  ;;  %v2368_v7 = vcombine.high %v2352_v63, %v2352_v63  ;;  %v2369_v15 = vcombine.high %v2359_v0, %v2359_v0 }
 0x14b   : > { %4017 = vst.msk [vmem:[%s4625_s30 + $0x132] sm:$0x1] %vm479_vm2, %v2359_v0  ;;  %4018 = vst.msk [vmem:[%s4625_s30 + $0x152] sm:$0x1] %vm479_vm2, %v2367_v3  ;;  %v2818_v8 = vrot.slane %v2809_v62, %v4707_v56  ;;  %v2616_v11 = vcombine.high %v2614_v10, %v2614_v10  ;;  %v2630_v12 = vrot.slane %v2614_v10, %v4707_v56 }
 0x14c   : > { %4020 = vst.msk [vmem:[%s4625_s30 + $0x192] sm:$0x1] %vm479_vm2, %v2352_v63  ;;  %v2637_v13 = vrot.slane %v2615_v5, %v4707_v56  ;;  %v2645_v16 = vcombine.high %v2623_v30, %v2623_v30  ;;  %4043 = vst.msk [vmem:[%s4625_s30 + $0x115] sm:$0x1] %vm479_vm2, %v2623_v30  ;;  %v2370_v31 = vcombine.high %v2366_v4, %v2366_v4 }
 0x14d   : > { %4019 = vst.msk [vmem:[%s4625_s30 + $0x172] sm:$0x1] %vm479_vm2, %v2369_v15  ;;  %4021 = vst.msk [vmem:[%s4625_s30 + $0x1b2] sm:$0x1] %vm479_vm2, %v2366_v4  ;;  %v2825_v14 = vrot.slane %v2811_v6, %v4707_v56  ;;  %v2826_v59 = vcombine.high %v2818_v8, %v2818_v8  ;;  %v2834_v17 = vrot.slane %v2818_v8, %v4707_v56 }
 0x14e   : > { %4022 = vst.msk [vmem:[%s4625_s30 + $0x1d2] sm:$0x1] %vm479_vm2, %v2368_v7  ;;  %v2644_v20 = vrot.slane %v2616_v11, %v4707_v56  ;;  %v2646_v21 = vcombine.high %v2630_v12, %v2630_v12  ;;  %v2647_v22 = vcombine.high %v2637_v13, %v2637_v13  ;;  %4044 = vst.msk [vmem:[%s4625_s30 + $0x135] sm:$0x1] %vm479_vm2, %v2637_v13 }
 0x14f   : > { %4045 = vst.msk [vmem:[%s4625_s30 + $0x155] sm:$0x1] %vm479_vm2, %v2645_v16  ;;  %4047 = vst.msk [vmem:[%s4625_s30 + $0x195] sm:$0x1] %vm479_vm2, %v2630_v12  ;;  %v2531_v38 = vadd.f32 %v4884_v39, %v4696_v52  ;;  %v2827_v60 = vcombine.high %v2825_v14, %v2825_v14  ;;  %v2841_v23 = vrot.slane %v2825_v14, %v4707_v56 }
 0x150   : > { %4023 = vst.msk [vmem:[%s4625_s30 + $0x1f2] sm:$0x1] %vm479_vm2, %v2370_v31  ;;  %v2848_v26 = vrot.slane %v2826_v59, %v4707_v56  ;;  %v2856_v27 = vcombine.high %v2834_v17, %v2834_v17  ;;  %4062 = vst.msk [vmem:[%s4625_s30 + $0x117] sm:$0x1] %vm479_vm2, %v2834_v17  ;;  %v2648_v28 = vcombine.high %v2644_v20, %v2644_v20 }
 0x151   : > { %4046 = vst.msk [vmem:[%s4625_s30 + $0x175] sm:$0x1] %vm479_vm2, %v2647_v22  ;;  %4048 = vst.msk [vmem:[%s4625_s30 + $0x1b5] sm:$0x1] %vm479_vm2, %v2644_v20  ;;  %v2533_v39 = vcombine.high %v2531_v38, %v2531_v38  ;;  %v2540_v51 = vrot.slane %v2531_v38, %v4707_v56  ;;  %v2742_v33 = vadd.f32 %v4886_v40, %v4696_v52 }
 0x152   : > { %4049 = vst.msk [vmem:[%s4625_s30 + $0x1d5] sm:$0x1] %vm479_vm2, %v2646_v21  ;;  %v2855_v32 = vrot.slane %v2827_v60, %v4707_v56  ;;  %v2857_v34 = vcombine.high %v2841_v23, %v2841_v23  ;;  %v2858_v35 = vcombine.high %v2848_v26, %v2848_v26  ;;  %4063 = vst.msk [vmem:[%s4625_s30 + $0x137] sm:$0x1] %vm479_vm2, %v2848_v26 }
 0x153   : > { %4064 = vst.msk [vmem:[%s4625_s30 + $0x157] sm:$0x1] %vm479_vm2, %v2856_v27  ;;  %4066 = vst.msk [vmem:[%s4625_s30 + $0x197] sm:$0x1] %vm479_vm2, %v2841_v23  ;;  %v3020_v36 = vadd.f32 %v4910_v57, %v4696_v52  ;;  %v2547_v41 = vrot.slane %v2533_v39, %v4707_v56  ;;  %v2548_v40 = vcombine.high %v2540_v51, %v2540_v51 }
 0x154   : > { %4050 = vst.msk [vmem:[%s4625_s30 + $0x1f5] sm:$0x1] %vm479_vm2, %v2648_v28  ;;  %v2556_v42 = vrot.slane %v2540_v51, %v4707_v56  ;;  %v2744_v37 = vcombine.high %v2742_v33, %v2742_v33  ;;  %v2859_v43 = vcombine.high %v2855_v32, %v2855_v32  ;;  %4065 = vst.msk [vmem:[%s4625_s30 + $0x177] sm:$0x1] %vm479_vm2, %v2858_v35 }
 0x155   : > { %4067 = vst.msk [vmem:[%s4625_s30 + $0x1b7] sm:$0x1] %vm479_vm2, %v2855_v32  ;;  %4068 = vst.msk [vmem:[%s4625_s30 + $0x1d7] sm:$0x1] %vm479_vm2, %v2857_v34  ;;  %v2751_v53 = vrot.slane %v2742_v33, %v4707_v56  ;;  %v3022_v57 = vcombine.high %v3020_v36, %v3020_v36  ;;  %v3029_v44 = vrot.slane %v3020_v36, %v4707_v56 }
 0x156   : > { %v2549_v45 = vcombine.high %v2547_v41, %v2547_v41  ;;  %v2563_v46 = vrot.slane %v2547_v41, %v4707_v56  ;;  %v2570_v47 = vrot.slane %v2548_v40, %v4707_v56  ;;  %v2578_v48 = vcombine.high %v2556_v42, %v2556_v42  ;;  %4035 = vst.msk [vmem:[%s4625_s30 + $0x114] sm:$0x1] %vm479_vm2, %v2556_v42 }
 0x157   : > { %4069 = vst.msk [vmem:[%s4625_s30 + $0x1f7] sm:$0x1] %vm479_vm2, %v2859_v43  ;;  %v2758_v49 = vrot.slane %v2744_v37, %v4707_v56  ;;  %v2759_v50 = vcombine.high %v2751_v53, %v2751_v53  ;;  %v2767_v54 = vrot.slane %v2751_v53, %v4707_v56  ;;  %v3036_v55 = vrot.slane %v3022_v57, %v4707_v56 }
 0x158   : > { %v2577_v29 = vrot.slane %v2549_v45, %v4707_v56  ;;  %v2579_v61 = vcombine.high %v2563_v46, %v2563_v46  ;;  %v2580_v62 = vcombine.high %v2570_v47, %v2570_v47  ;;  %4036 = vst.msk [vmem:[%s4625_s30 + $0x134] sm:$0x1] %vm479_vm2, %v2570_v47  ;;  %4037 = vst.msk [vmem:[%s4625_s30 + $0x154] sm:$0x1] %vm479_vm2, %v2578_v48 }
 0x159   : > { %4039 = vst.msk [vmem:[%s4625_s30 + $0x194] sm:$0x1] %vm479_vm2, %v2563_v46  ;;  %v3037_v9 = vcombine.high %v3029_v44, %v3029_v44  ;;  %v2760_v63 = vcombine.high %v2758_v49, %v2758_v49  ;;  %v2774_v0 = vrot.slane %v2758_v49, %v4707_v56  ;;  %v2781_v3 = vrot.slane %v2759_v50, %v4707_v56 }
 0x15a   : > { %v2789_v10 = vcombine.high %v2767_v54, %v2767_v54  ;;  %4054 = vst.msk [vmem:[%s4625_s30 + $0x116] sm:$0x1] %vm479_vm2, %v2767_v54  ;;  %v2581_v5 = vcombine.high %v2577_v29, %v2577_v29  ;;  %4038 = vst.msk [vmem:[%s4625_s30 + $0x174] sm:$0x1] %vm479_vm2, %v2580_v62  ;;  %v3038_v30 = vcombine.high %v3036_v55, %v3036_v55 }
 0x15b   : > { %4040 = vst.msk [vmem:[%s4625_s30 + $0x1b4] sm:$0x1] %vm479_vm2, %v2577_v29  ;;  %4041 = vst.msk [vmem:[%s4625_s30 + $0x1d4] sm:$0x1] %vm479_vm2, %v2579_v61  ;;  %v3045_v6 = vrot.slane %v3029_v44, %v4707_v56  ;;  %v3052_v4 = vrot.slane %v3036_v55, %v4707_v56  ;;  %v2788_v7 = vrot.slane %v2760_v63, %v4707_v56 }
 0x15c   : > { %v2790_v15 = vcombine.high %v2774_v0, %v2774_v0  ;;  %v2791_v8 = vcombine.high %v2781_v3, %v2781_v3  ;;  %4055 = vst.msk [vmem:[%s4625_s30 + $0x136] sm:$0x1] %vm479_vm2, %v2781_v3  ;;  %4056 = vst.msk [vmem:[%s4625_s30 + $0x156] sm:$0x1] %vm479_vm2, %v2789_v10  ;;  %v3059_v11 = vrot.slane %v3037_v9, %v4707_v56 }
 0x15d   : > { %4058 = vst.msk [vmem:[%s4625_s30 + $0x196] sm:$0x1] %vm479_vm2, %v2774_v0  ;;  %4042 = vst.msk [vmem:[%s4625_s30 + $0x1f4] sm:$0x1] %vm479_vm2, %v2581_v5  ;;  %v3066_v12 = vrot.slane %v3038_v30, %v4707_v56  ;;  %v3067_v13 = vcombine.high %v3045_v6, %v3045_v6  ;;  %v3068_v16 = vcombine.high %v3052_v4, %v3052_v4 }
 0x15e   : > { %4081 = vst.msk [vmem:[%s4625_s30 + $0x119] sm:$0x1] %vm479_vm2, %v3045_v6  ;;  %4085 = vst.msk [vmem:[%s4625_s30 + $0x199] sm:$0x1] %vm479_vm2, %v3052_v4  ;;  %v3231_v31 = vadd.f32 %v4912_v58, %v4696_v52  ;;  %v2792_v14 = vcombine.high %v2788_v7, %v2788_v7  ;;  %v3069_v59 = vcombine.high %v3059_v11, %v3059_v11 }
 0x15f   : > { %4057 = vst.msk [vmem:[%s4625_s30 + $0x176] sm:$0x1] %vm479_vm2, %v2791_v8  ;;  %4059 = vst.msk [vmem:[%s4625_s30 + $0x1b6] sm:$0x1] %vm479_vm2, %v2788_v7  ;;  %v2953_v17 = vadd.f32 %v4924_v1, %v4696_v52  ;;  %v3164_v20 = vadd.f32 %v4926_v2, %v4696_v52  ;;  %v3070_v58 = vcombine.high %v3066_v12, %v3066_v12 }
 0x160   : > { %4060 = vst.msk [vmem:[%s4625_s30 + $0x1d6] sm:$0x1] %vm479_vm2, %v2790_v15  ;;  %4082 = vst.msk [vmem:[%s4625_s30 + $0x139] sm:$0x1] %vm479_vm2, %v3059_v11  ;;  %v3233_v21 = vcombine.high %v3231_v31, %v3231_v31  ;;  %v3240_v22 = vrot.slane %v3231_v31, %v4707_v56  ;;  %v3442_v38 = vadd.f32 %v4950_v18, %v4696_v52 }
 0x161   : > { %4083 = vst.msk [vmem:[%s4625_s30 + $0x159] sm:$0x1] %vm479_vm2, %v3067_v13  ;;  %4086 = vst.msk [vmem:[%s4625_s30 + $0x1b9] sm:$0x1] %vm479_vm2, %v3066_v12  ;;  %v2955_v1 = vcombine.high %v2953_v17, %v2953_v17  ;;  %v2962_v2 = vrot.slane %v2953_v17, %v4707_v56  ;;  %v3166_v60 = vcombine.high %v3164_v20, %v3164_v20 }
 0x162   : > { %4087 = vst.msk [vmem:[%s4625_s30 + $0x1d9] sm:$0x1] %vm479_vm2, %v3068_v16  ;;  %4061 = vst.msk [vmem:[%s4625_s30 + $0x1f6] sm:$0x1] %vm479_vm2, %v2792_v14  ;;  %v3173_v23 = vrot.slane %v3164_v20, %v4707_v56  ;;  %v3247_v26 = vrot.slane %v3233_v21, %v4707_v56  ;;  %v3248_v27 = vcombine.high %v3240_v22, %v3240_v22 }
 0x163   : > { %4084 = vst.msk [vmem:[%s4625_s30 + $0x179] sm:$0x1] %vm479_vm2, %v3069_v59  ;;  %4088 = vst.msk [vmem:[%s4625_s30 + $0x1f9] sm:$0x1] %vm479_vm2, %v3070_v58  ;;  %v3256_v28 = vrot.slane %v3240_v22, %v4707_v56  ;;  %v3444_v18 = vcombine.high %v3442_v38, %v3442_v38  ;;  %v2969_v39 = vrot.slane %v2955_v1, %v4707_v56 }
 0x164   : > { %v2970_v51 = vcombine.high %v2962_v2, %v2962_v2  ;;  %v2978_v33 = vrot.slane %v2962_v2, %v4707_v56  ;;  %v3180_v32 = vrot.slane %v3166_v60, %v4707_v56  ;;  %v3249_v34 = vcombine.high %v3247_v26, %v3247_v26 }
 0x165   : > { %v3263_v35 = vrot.slane %v3247_v26, %v4707_v56  ;;  %v3270_v36 = vrot.slane %v3248_v27, %v4707_v56  ;;  %v3278_v41 = vcombine.high %v3256_v28, %v3256_v28  ;;  %4100 = vst.msk [vmem:[%s4625_s30 + $0x11b] sm:$0x1] %vm479_vm2, %v3256_v28  ;;  %v2971_v40 = vcombine.high %v2969_v39, %v2969_v39 }
 0x166   : > { %v2985_v42 = vrot.slane %v2969_v39, %v4707_v56  ;;  %v2992_v37 = vrot.slane %v2970_v51, %v4707_v56  ;;  %v3000_v43 = vcombine.high %v2978_v33, %v2978_v33  ;;  %4073 = vst.msk [vmem:[%s4625_s30 + $0x118] sm:$0x1] %vm479_vm2, %v2978_v33  ;;  %v3277_v53 = vrot.slane %v3249_v34, %v4707_v56 }
 0x167   : > { %v3279_v57 = vcombine.high %v3263_v35, %v3263_v35  ;;  %v3280_v44 = vcombine.high %v3270_v36, %v3270_v36  ;;  %4101 = vst.msk [vmem:[%s4625_s30 + $0x13b] sm:$0x1] %vm479_vm2, %v3270_v36  ;;  %4102 = vst.msk [vmem:[%s4625_s30 + $0x15b] sm:$0x1] %vm479_vm2, %v3278_v41  ;;  %v3181_v45 = vcombine.high %v3173_v23, %v3173_v23 }
 0x168   : > { %4104 = vst.msk [vmem:[%s4625_s30 + $0x19b] sm:$0x1] %vm479_vm2, %v3263_v35  ;;  %v2999_v46 = vrot.slane %v2971_v40, %v4707_v56  ;;  %v3001_v47 = vcombine.high %v2985_v42, %v2985_v42  ;;  %v3002_v48 = vcombine.high %v2992_v37, %v2992_v37  ;;  %4074 = vst.msk [vmem:[%s4625_s30 + $0x138] sm:$0x1] %vm479_vm2, %v2992_v37 }
 0x169   : > { %4075 = vst.msk [vmem:[%s4625_s30 + $0x158] sm:$0x1] %vm479_vm2, %v3000_v43  ;;  %4077 = vst.msk [vmem:[%s4625_s30 + $0x198] sm:$0x1] %vm479_vm2, %v2985_v42  ;;  %v3182_v49 = vcombine.high %v3180_v32, %v3180_v32  ;;  %v3281_v50 = vcombine.high %v3277_v53, %v3277_v53  ;;  %v3189_v54 = vrot.slane %v3173_v23, %v4707_v56 }
 0x16a   : > { %4103 = vst.msk [vmem:[%s4625_s30 + $0x17b] sm:$0x1] %vm479_vm2, %v3280_v44  ;;  %4105 = vst.msk [vmem:[%s4625_s30 + $0x1bb] sm:$0x1] %vm479_vm2, %v3277_v53  ;;  %v3196_v55 = vrot.slane %v3180_v32, %v4707_v56  ;;  %v3203_v29 = vrot.slane %v3181_v45, %v4707_v56  ;;  %v3003_v61 = vcombine.high %v2999_v46, %v2999_v46 }
 0x16b   : > { %4106 = vst.msk [vmem:[%s4625_s30 + $0x1db] sm:$0x1] %vm479_vm2, %v3279_v57  ;;  %4076 = vst.msk [vmem:[%s4625_s30 + $0x178] sm:$0x1] %vm479_vm2, %v3002_v48  ;;  %v3210_v62 = vrot.slane %v3182_v49, %v4707_v56  ;;  %v3451_v9 = vrot.slane %v3442_v38, %v4707_v56  ;;  %v3458_v63 = vrot.slane %v3444_v18, %v4707_v56 }
 0x16c   : > { %4078 = vst.msk [vmem:[%s4625_s30 + $0x1b8] sm:$0x1] %vm479_vm2, %v2999_v46  ;;  %4079 = vst.msk [vmem:[%s4625_s30 + $0x1d8] sm:$0x1] %vm479_vm2, %v3001_v47  ;;  %v3211_v0 = vcombine.high %v3189_v54, %v3189_v54  ;;  %v3212_v3 = vcombine.high %v3196_v55, %v3196_v55  ;;  %v3213_v10 = vcombine.high %v3203_v29, %v3203_v29 }
 0x16d   : > { %4107 = vst.msk [vmem:[%s4625_s30 + $0x1fb] sm:$0x1] %vm479_vm2, %v3281_v50  ;;  %4092 = vst.msk [vmem:[%s4625_s30 + $0x11a] sm:$0x1] %vm479_vm2, %v3189_v54  ;;  %v3653_v5 = vadd.f32 %v4952_v19, %v4696_v52  ;;  %v3214_v30 = vcombine.high %v3210_v62, %v3210_v62  ;;  %v3459_v6 = vcombine.high %v3451_v9, %v3451_v9 }
 0x16e   : > { %4093 = vst.msk [vmem:[%s4625_s30 + $0x13a] sm:$0x1] %vm479_vm2, %v3203_v29  ;;  %4096 = vst.msk [vmem:[%s4625_s30 + $0x19a] sm:$0x1] %vm479_vm2, %v3196_v55  ;;  %v3460_v4 = vcombine.high %v3458_v63, %v3458_v63  ;;  %v3467_v7 = vrot.slane %v3451_v9, %v4707_v56  ;;  %v3474_v15 = vrot.slane %v3458_v63, %v4707_v56 }
 0x16f   : > { %4080 = vst.msk [vmem:[%s4625_s30 + $0x1f8] sm:$0x1] %vm479_vm2, %v3003_v61  ;;  %4097 = vst.msk [vmem:[%s4625_s30 + $0x1ba] sm:$0x1] %vm479_vm2, %v3210_v62  ;;  %v3655_v19 = vcombine.high %v3653_v5, %v3653_v5  ;;  %v3662_v8 = vrot.slane %v3653_v5, %v4707_v56  ;;  %v3375_v11 = vadd.f32 %v4964_v24, %v4696_v52 }
 0x170   : > { %4094 = vst.msk [vmem:[%s4625_s30 + $0x15a] sm:$0x1] %vm479_vm2, %v3211_v0  ;;  %4095 = vst.msk [vmem:[%s4625_s30 + $0x17a] sm:$0x1] %vm479_vm2, %v3213_v10  ;;  %v3481_v12 = vrot.slane %v3459_v6, %v4707_v56  ;;  %v3488_v13 = vrot.slane %v3460_v4, %v4707_v56  ;;  %v3489_v16 = vcombine.high %v3467_v7, %v3467_v7 }
 0x171   : > { %4098 = vst.msk [vmem:[%s4625_s30 + $0x1da] sm:$0x1] %vm479_vm2, %v3212_v3  ;;  %4099 = vst.msk [vmem:[%s4625_s30 + $0x1fa] sm:$0x1] %vm479_vm2, %v3214_v30  ;;  %v3586_v31 = vadd.f32 %v4966_v25, %v4696_v52  ;;  %v3490_v14 = vcombine.high %v3474_v15, %v3474_v15  ;;  %v3669_v24 = vrot.slane %v3655_v19, %v4707_v56 }
 0x172   : > { %4119 = vst.msk [vmem:[%s4625_s30 + $0x11d] sm:$0x1] %vm479_vm2, %v3467_v7  ;;  %4123 = vst.msk [vmem:[%s4625_s30 + $0x19d] sm:$0x1] %vm479_vm2, %v3474_v15  ;;  %v3670_v59 = vcombine.high %v3662_v8, %v3662_v8  ;;  %v3678_v17 = vrot.slane %v3662_v8, %v4707_v56  ;;  %v3491_v20 = vcombine.high %v3481_v12, %v3481_v12 }
 0x173   : > { %v3492_v58 = vcombine.high %v3488_v13, %v3488_v13  ;;  %4120 = vst.msk [vmem:[%s4625_s30 + $0x13d] sm:$0x1] %vm479_vm2, %v3481_v12  ;;  %4121 = vst.msk [vmem:[%s4625_s30 + $0x15d] sm:$0x1] %vm479_vm2, %v3489_v16  ;;  %v3377_v52 = vcombine.high %v3375_v11, %v3375_v11  ;;  %v3384_v25 = vrot.slane %v3375_v11, %v4707_v56 }
 0x174   : > { %4124 = vst.msk [vmem:[%s4625_s30 + $0x1bd] sm:$0x1] %vm479_vm2, %v3488_v13  ;;  %4125 = vst.msk [vmem:[%s4625_s30 + $0x1dd] sm:$0x1] %vm479_vm2, %v3490_v14  ;;  %v3671_v21 = vcombine.high %v3669_v24, %v3669_v24  ;;  %v3685_v22 = vrot.slane %v3669_v24, %v4707_v56  ;;  %v3692_v38 = vrot.slane %v3670_v59, %v4707_v56 }
 0x175   : > { %v3700_v1 = vcombine.high %v3678_v17, %v3678_v17  ;;  %4138 = vst.msk [vmem:[%s4625_s30 + $0x11f] sm:$0x1] %vm479_vm2, %v3678_v17  ;;  %4122 = vst.msk [vmem:[%s4625_s30 + $0x17d] sm:$0x1] %vm479_vm2, %v3491_v20  ;;  %v3391_v2 = vrot.slane %v3377_v52, %v4707_v56  ;;  %v3392_v60 = vcombine.high %v3384_v25, %v3384_v25 }
 0x176   : > { %4126 = vst.msk [vmem:[%s4625_s30 + $0x1fd] sm:$0x1] %vm479_vm2, %v3492_v58  ;;  %v3400_v23 = vrot.slane %v3384_v25, %v4707_v56  ;;  %v3588_v26 = vcombine.high %v3586_v31, %v3586_v31  ;;  %v3699_v27 = vrot.slane %v3671_v21, %v4707_v56  ;;  %v3701_v28 = vcombine.high %v3685_v22, %v3685_v22 }
 0x177   : > { %v3702_v18 = vcombine.high %v3692_v38, %v3692_v38  ;;  %4139 = vst.msk [vmem:[%s4625_s30 + $0x13f] sm:$0x1] %vm479_vm2, %v3692_v38  ;;  %4140 = vst.msk [vmem:[%s4625_s30 + $0x15f] sm:$0x1] %vm479_vm2, %v3700_v1  ;;  %v3595_v39 = vrot.slane %v3586_v31, %v4707_v56  ;;  %v3393_v51 = vcombine.high %v3391_v2, %v3391_v2 }
 0x178   : > { %4142 = vst.msk [vmem:[%s4625_s30 + $0x19f] sm:$0x1] %vm479_vm2, %v3685_v22  ;;  %v3407_v33 = vrot.slane %v3391_v2, %v4707_v56  ;;  %v3414_v32 = vrot.slane %v3392_v60, %v4707_v56  ;;  %v3422_v34 = vcombine.high %v3400_v23, %v3400_v23  ;;  %4111 = vst.msk [vmem:[%s4625_s30 + $0x11c] sm:$0x1] %vm479_vm2, %v3400_v23 }
 0x179   : > { %v3703_v35 = vcombine.high %v3699_v27, %v3699_v27  ;;  %4141 = vst.msk [vmem:[%s4625_s30 + $0x17f] sm:$0x1] %vm479_vm2, %v3702_v18  ;;  %4143 = vst.msk [vmem:[%s4625_s30 + $0x1bf] sm:$0x1] %vm479_vm2, %v3699_v27  ;;  %v3602_v36 = vrot.slane %v3588_v26, %v4707_v56  ;;  %v3603_v41 = vcombine.high %v3595_v39, %v3595_v39 }
 0x17a   : > { %4144 = vst.msk [vmem:[%s4625_s30 + $0x1df] sm:$0x1] %vm479_vm2, %v3701_v28  ;;  %v3611_v40 = vrot.slane %v3595_v39, %v4707_v56  ;;  %v3421_v42 = vrot.slane %v3393_v51, %v4707_v56  ;;  %v3423_v37 = vcombine.high %v3407_v33, %v3407_v33  ;;  %v3424_v43 = vcombine.high %v3414_v32, %v3414_v32 }
 0x17b   : > { %4112 = vst.msk [vmem:[%s4625_s30 + $0x13c] sm:$0x1] %vm479_vm2, %v3414_v32  ;;  %4113 = vst.msk [vmem:[%s4625_s30 + $0x15c] sm:$0x1] %vm479_vm2, %v3422_v34  ;;  %v3604_v53 = vcombine.high %v3602_v36, %v3602_v36  ;;  %v3618_v57 = vrot.slane %v3602_v36, %v4707_v56  ;;  %v3625_v44 = vrot.slane %v3603_v41, %v4707_v56 }
 0x17c   : > { %4115 = vst.msk [vmem:[%s4625_s30 + $0x19c] sm:$0x1] %vm479_vm2, %v3407_v33  ;;  %4145 = vst.msk [vmem:[%s4625_s30 + $0x1ff] sm:$0x1] %vm479_vm2, %v3703_v35  ;;  %v3633_v45 = vcombine.high %v3611_v40, %v3611_v40  ;;  %v3425_v46 = vcombine.high %v3421_v42, %v3421_v42 }
 0x17d   : > { %4130 = vst.msk [vmem:[%s4625_s30 + $0x11e] sm:$0x1] %vm479_vm2, %v3611_v40  ;;  %4114 = vst.msk [vmem:[%s4625_s30 + $0x17c] sm:$0x1] %vm479_vm2, %v3424_v43  ;;  %v3632_v47 = vrot.slane %v3604_v53, %v4707_v56  ;;  %v3634_v48 = vcombine.high %v3618_v57, %v3618_v57  ;;  %v3635_v49 = vcombine.high %v3625_v44, %v3625_v44 }
 0x17e   : > { %4116 = vst.msk [vmem:[%s4625_s30 + $0x1bc] sm:$0x1] %vm479_vm2, %v3421_v42  ;;  %4117 = vst.msk [vmem:[%s4625_s30 + $0x1dc] sm:$0x1] %vm479_vm2, %v3423_v37 }
 0x17f   : > { %4131 = vst.msk [vmem:[%s4625_s30 + $0x13e] sm:$0x1] %vm479_vm2, %v3625_v44  ;;  %4132 = vst.msk [vmem:[%s4625_s30 + $0x15e] sm:$0x1] %vm479_vm2, %v3633_v45  ;;  %v3636_v56 = vcombine.high %v3632_v47, %v3632_v47 }
 0x180   : > { %4134 = vst.msk [vmem:[%s4625_s30 + $0x19e] sm:$0x1] %vm479_vm2, %v3618_v57  ;;  %4118 = vst.msk [vmem:[%s4625_s30 + $0x1fc] sm:$0x1] %vm479_vm2, %v3425_v46 }
 0x181   : > { %4133 = vst.msk [vmem:[%s4625_s30 + $0x17e] sm:$0x1] %vm479_vm2, %v3635_v49  ;;  %4135 = vst.msk [vmem:[%s4625_s30 + $0x1be] sm:$0x1] %vm479_vm2, %v3632_v47 }
 0x182   : > { %4136 = vst.msk [vmem:[%s4625_s30 + $0x1de] sm:$0x1] %vm479_vm2, %v3634_v48  ;;  %4137 = vst.msk [vmem:[%s4625_s30 + $0x1fe] sm:$0x1] %vm479_vm2, %v3636_v56 }
 0x183   : > { %4355 = shalt.err (!%p4352_p5)
}
 0x184   : > { %s4356_s14 = scalar_lea.hbm %s5553_s8, 8192  ;;  %s4360_s24 = scalar_lea.hbm %s5617_s4, 16384 }
 0x185   : > { %p4357_p6 = scmp.ne.s32.totalorder %s5553_s8, %s4356_s14  ;;  %p4361_p10 = scmp.lt.u32.totalorder %s5553_s8, %s5617_s4 }
 0x186   : > { %p4362_p11 = scmp.lt.u32.totalorder %s4360_s24, %s4356_s14  ;;  %p4364_p13 = scmp.lt.u32.totalorder %s4356_s14, %s5553_s8 }
 0x187   : > { %p4358_p7 = pnand %p4357_p6, %p4492_p4 }
 0x188   : > { %p4363_p12 = por %p4362_p11, %p4361_p10 }
 0x189   : > { %p4359_p9 = pneg %p4358_p7 }
 0x18a   : > { %p4365_p0 = por %p4364_p13, %p4363_p12 }
 0x18c   : > { %p4366_p1 = pnand %p4365_p0, %p4359_p9 }
 0x18e   : > { %4369 = shalt.err (!%p4366_p1)
}
 0x18f   : > { %s4425_s30 = smov 128   ;;  %s4426_s5 = smov 8  }
 0x190   : > { %4282 = dma.vmem_to_hbm [thread:$0]  (%p4492_p4), %s5555_s6, 8192, %s5553_s8, %s5567_s9, %s4425_s30, %s4425_s30, %s4426_s5  }
 0x191 PF: > { %p4288_p2 = scmp.ge.s32.totalorder %s4420_s20, 2  ;;  %s3751_s18 = sand.u32 1, %s4400_s15  }
 0x192   : > { %s3752_s7 = scalar_lea.sflag [#allocation3], %s3751_s18 }
 0x193   : > { %p4285_p3 = pnand %p4288_p2, %p4499_p8 }
 0x195   : > { %4395 = dma.done.wait (!%p4285_p3), %s3752_s7, 8192  }
 0x196   : > { %4397 = vsyncadd (!%p4285_p3), %s3752_s7, 4294959104  ;;  %s17_s20 = sadd.s32 1, %s4420_s20   ;;  %s5620_s15 = smov %s4404_s16 }
 0x197   : > { %p14_p5 = scmp.ge.s32.totalorder %s17_s20, 4   ;;  %s5621_s16 = smov %s4408_s17 }
 0x198   : > { %s5622_s17 = smov %s4505_s28  ;;  %s5623_s18 = smov %s4416_s19 }
 0x199   : > { %s5624_s19 = smov %s5626_s23  ;;  %16 = sbr.rel (!%p14_p5) target bundleno = 4 (0x4), region = 90 }
 0x1a0   :  { %3757 = vsyncpa [#allocation3], 1 }
 0x1a1   :  { %3759 = vsyncpa [#allocation3 + $0x1], 1 }

</bundles_post_ra>
